<compile_context>
chip_gen: v7x
topology: tpu7x:2x2x1
jax: 0.10.0
libtpu: 0.0.40
codegen_flags: <defaults>
</compile_context>

<pallas_src>
import functools

import jax
import jax.numpy as jnp
from jax import lax
from jax.experimental import pallas as pl
from jax.experimental.pallas import tpu as pltpu


# ----------------------------------------------------------------------------
# Helpers
# ----------------------------------------------------------------------------
def _round_up(x, m):
    return (x + m - 1) // m * m


def _fold_bn(gamma, beta, running_mean, running_var, eps=1e-5):
    scale = gamma / jnp.sqrt(running_var + eps)
    bias = beta - running_mean * scale
    return scale, bias


# ----------------------------------------------------------------------------
# Fused BasicBlock kernel (one image per grid step)
# ----------------------------------------------------------------------------
def _make_block_kernel(*, shifts1, shifts2, m1p, lead, cout,
                       has_sc_input, sc_offset):
    """Builds the fused conv1+bn1+relu+conv2+bn2+residual+relu kernel.

    shifts1 : static row offsets of the conv1 taps into the flat activation.
    shifts2 : static row offsets of the conv2 taps into the VMEM scratch.
    m1p     : padded number of output-anchor rows per image.
    lead    : 8-aligned row at which conv1's output is staged in the scratch.
    cout    : narrow lane width of the HBM output (round_up(planes, 8)).
    """

    def body(x_ref, w1_ref, b1_ref, m1_ref, w2_ref, b2_ref, o_ref, s2_ref, sc):
        cp = w1_ref.shape[-1]                 # 128-wide MXU/accumulator lanes

        # conv1 (+ folded BN1): in-kernel im2col as shifted-slab matmuls.
        acc1 = jnp.zeros((m1p, cp), jnp.float32)
        for t, off in enumerate(shifts1):
            lhs = x_ref[pl.ds(off, m1p), :].astype(jnp.bfloat16)
            acc1 = acc1 + jnp.dot(lhs, w1_ref[t],
                                  preferred_element_type=jnp.float32)
        # bias + ReLU; mask zeroes the garbage columns / padded rows so they
        # act as conv2's zero padding ring.
        y1 = jnp.maximum(acc1 + b1_ref[...], 0.0) * m1_ref[...]

        # Stage conv1's output into conv2's zero-padded flat grid in VMEM
        # (no HBM round-trip).  Store is 8-row aligned; tap reads below are
        # unaligned, which is the cheap direction.
        s2_ref[...] = jnp.zeros(s2_ref.shape, s2_ref.dtype)
        s2_ref[pl.ds(lead, m1p), :] = y1

        # conv2 (+ folded BN2): 9 shifted-slab matmuls on the scratch.
        acc2 = jnp.zeros((m1p, cp), jnp.float32)
        for t, off in enumerate(shifts2):
            lhs = s2_ref[pl.ds(off, m1p), :].astype(jnp.bfloat16)
            acc2 = acc2 + jnp.dot(lhs, w2_ref[t],
                                  preferred_element_type=jnp.float32)

        # Residual add + ReLU on the narrow (cout) lane slice only; store.
        out = jnp.maximum(acc2[:, :cout] + b2_ref[...] + sc, 0.0)
        o_ref[...] = out.astype(o_ref.dtype)

    if has_sc_input:
        def kernel(x_ref, w1_ref, b1_ref, m1_ref, w2_ref, b2_ref, sc_ref,
                   o_ref, s2_ref):
            body(x_ref, w1_ref, b1_ref, m1_ref, w2_ref, b2_ref, o_ref, s2_ref,
                 sc_ref[...])
    else:
        def kernel(x_ref, w1_ref, b1_ref, m1_ref, w2_ref, b2_ref,
                   o_ref, s2_ref):
            # Identity shortcut: reuse the resident activation block.
            body(x_ref, w1_ref, b1_ref, m1_ref, w2_ref, b2_ref, o_ref, s2_ref,
                 x_ref[pl.ds(sc_offset, m1p), :])
    return kernel


# ----------------------------------------------------------------------------
# Wrapper: layout plumbing in XLA, all compute in the fused Pallas kernel.
# ----------------------------------------------------------------------------
def basic_block_forward(x_nchw, params, *, stride, in_planes, planes):
    assert stride in (1, 2), "only stride 1 or 2 is supported"
    x = jnp.transpose(x_nchw, (0, 2, 3, 1)).astype(jnp.float32)      # NHWC
    N, H, W, Cin = x.shape
    assert Cin == in_planes

    Ho = (H - 1) // stride + 1
    Wo = (W - 1) // stride + 1
    RW = Wo + 2                        # shared flat row width (conv2 padded grid)
    M1 = Ho * RW                       # anchor rows per image (incl. 2 garbage cols)
    M1P = _round_up(M1, 8)

    CP = _round_up(planes, 128)        # MXU / accumulator lane width
    COUT = _round_up(planes, 8)        # narrow HBM output lane width

    identity = (stride == 1) and (in_planes == planes)

    # ---- conv1 operand as a per-image row-flattened padded activation -------
    x_pad = jnp.pad(x, ((0, 0), (1, 1), (1, 1), (0, 0)))
    w1_hwio = jnp.transpose(params["conv1_w"], (2, 3, 1, 0))          # HWIO
    if stride == 1:
        xin = x_pad.reshape(N, (H + 2) * (W + 2), Cin)
        K1 = Cin
        w1_taps = w1_hwio.reshape(9, Cin, planes)
        shifts1 = tuple(kh * RW + kw for kh in range(3) for kw in range(3))
    else:
        # Space-to-depth so the stride-2 3x3 conv becomes a stride-1 2x2 conv
        # over 4*Cin channels -> same shifted-slab kernel structure as stride 1.
        assert H % 2 == 0 and W % 2 == 0, "stride-2 path assumes even H, W"
        Hh, Wh = (H + 2) // 2, (W + 2) // 2                           # Ho+1, Wo+1
        x_ph = x_pad.reshape(N, Hh, 2, Wh, 2, Cin)
        x_ph = x_ph.transpose(0, 1, 3, 2, 4, 5).reshape(N, Hh, Wh, 4 * Cin)
        x_ph = jnp.pad(x_ph, ((0, 0), (0, 0), (0, RW - Wh), (0, 0)))  # width->RW
        xin = x_ph.reshape(N, Hh * RW, 4 * Cin)
        K1 = 4 * Cin
        w1p = jnp.pad(w1_hwio, ((0, 1), (0, 1), (0, 0), (0, 0)))      # 3x3 -> 4x4
        w1_taps = (w1p.reshape(2, 2, 2, 2, Cin, planes)
                       .transpose(0, 2, 1, 3, 4, 5)
                       .reshape(4, 4 * Cin, planes))
        shifts1 = tuple(ah * RW + aw for ah in range(2) for aw in range(2))

    if identity and K1 < COUT:
        # Widen lanes so the in-kernel residual slab matches the output width.
        xin = jnp.pad(xin, ((0, 0), (0, 0), (0, COUT - K1)))
        w1_taps = jnp.pad(w1_taps, ((0, 0), (0, COUT - K1), (0, 0)))
        K1 = COUT

    R1 = xin.shape[1]
    R1P = _round_up(max(R1, M1P + max(shifts1)), 8)
    xin = jnp.pad(xin, ((0, 0), (0, R1P - R1), (0, 0)))               # f32

    # ---- fold BN into weights/bias; pad to MXU lane width --------------------
    s1, b1 = _fold_bn(*params["bn1"])
    s2, b2 = _fold_bn(*params["bn2"])
    w1_taps = w1_taps * s1[None, None, :]
    w1_full = jnp.pad(w1_taps, ((0, 0), (0, 0), (0, CP - planes))
                      ).astype(jnp.bfloat16)
    b1_full = jnp.pad(b1.reshape(1, planes), ((0, 0), (0, CP - planes)))

    w2_hwio = jnp.transpose(params["conv2_w"], (2, 3, 1, 0)).reshape(
        9, planes, planes)
    w2_taps = w2_hwio * s2[None, None, :]
    w2_full = jnp.pad(w2_taps, ((0, 0), (0, CP - planes), (0, CP - planes))
                      ).astype(jnp.bfloat16)
    b2_out = jnp.pad(b2.reshape(1, planes), ((0, 0), (0, COUT - planes)))

    # Row-validity mask (zeroes garbage columns / padded rows of conv1 output
    # so they act as conv2's zero padding).
    rows = jnp.arange(M1P, dtype=jnp.int32)
    mask = (((rows % RW) < Wo) & (rows < M1)).astype(jnp.float32).reshape(M1P, 1)

    # ---- option-A shortcut (exactly as in the PyTorch module) ----------------
    if not identity:
        sc = x[:, ::2, ::2, :]
        pad_c = planes // 4
        sc = jnp.pad(sc, ((0, 0), (0, 0), (0, 0), (pad_c, pad_c)))
        assert sc.shape[1] == Ho and sc.shape[2] == Wo and sc.shape[3] == planes, (
            "option-A shortcut shape does not match the residual branch")
        sc = jnp.pad(sc, ((0, 0), (0, 0), (0, RW - Wo), (0, COUT - planes)))
        sc = sc.reshape(N, M1, COUT)
        sc = jnp.pad(sc, ((0, 0), (0, M1P - M1), (0, 0))).astype(jnp.float32)

    # ---- conv2 scratch geometry ----------------------------------------------
    LEAD = _round_up(RW + 1, 8)                      # aligned staging row
    shifts2 = tuple(LEAD - RW - 1 + kh * RW + kw
                    for kh in range(3) for kw in range(3))
    S2P = _round_up(M1P + max(shifts2), 8)

    kernel = _make_block_kernel(shifts1=shifts1, shifts2=shifts2, m1p=M1P,
                                lead=LEAD, cout=COUT,
                                has_sc_input=not identity, sc_offset=RW + 1)

    in_specs = [
        pl.BlockSpec((None, R1P, K1), lambda n: (n, 0, 0)),           # activation
        pl.BlockSpec((len(shifts1), K1, CP), lambda n: (0, 0, 0)),    # w1 (resident)
        pl.BlockSpec((1, CP), lambda n: (0, 0)),                      # b1
        pl.BlockSpec((M1P, 1), lambda n: (0, 0)),                     # row mask
        pl.BlockSpec((9, CP, CP), lambda n: (0, 0, 0)),               # w2 (resident)
        pl.BlockSpec((1, COUT), lambda n: (0, 0)),                    # b2
    ]
    args = [xin, w1_full, b1_full, mask, w2_full, b2_out]
    if not identity:
        in_specs.append(pl.BlockSpec((None, M1P, COUT), lambda n: (n, 0, 0)))
        args.append(sc)

    flops = N * (2 * M1P * K1 * CP * len(shifts1) + 2 * M1P * CP * CP * 9)
    bytes_accessed = (xin.size * 4 + w1_full.size * 2 + w2_full.size * 2
                      + (b1_full.size + b2_out.size + mask.size) * 4
                      + (0 if identity else sc.size * 4)
                      + N * M1P * COUT * 4)

    vmem_est = (2 * (R1P * K1 * 4 + M1P * COUT * 4
                     + (0 if identity else M1P * COUT * 4))
                + 2 * (w1_full.size + w2_full.size) * 2
                + 2 * (b1_full.size + b2_out.size + mask.size) * 4
                + S2P * CP * 4)
    vmem_limit = int(min(64 * 2 ** 20, max(16 * 2 ** 20, 4 * vmem_est)))

    out_flat = pl.pallas_call(
        kernel,
        out_shape=jax.ShapeDtypeStruct((N, M1P, COUT), jnp.float32),
        grid_spec=pltpu.PrefetchScalarGridSpec(
            num_scalar_prefetch=0,
            grid=(N,),
            in_specs=in_specs,
            out_specs=pl.BlockSpec((None, M1P, COUT), lambda n: (n, 0, 0)),
            scratch_shapes=[pltpu.VMEM((S2P, CP), jnp.float32)],
        ),
        compiler_params=pltpu.CompilerParams(
            dimension_semantics=("parallel",),
            vmem_limit_bytes=vmem_limit),
        cost_estimate=pl.CostEstimate(flops=flops, transcendentals=0,
                                      bytes_accessed=bytes_accessed),
    )(*args)

    # Strip garbage columns / lane padding, back to NCHW.
    out = out_flat[:, :M1, :planes].reshape(N, Ho, RW, planes)[:, :, :Wo, :]
    return jnp.transpose(out, (0, 3, 1, 2))


# ----------------------------------------------------------------------------
# Pure-JAX reference matching the kernel's numerics (bf16 operands, f32 acc).
# ----------------------------------------------------------------------------
def basic_block_reference(x_nchw, params, *, stride, in_planes, planes):
    x = jnp.transpose(x_nchw, (0, 2, 3, 1)).astype(jnp.float32)

    def conv3x3(inp, w_oihw, scale, s):
        w = jnp.transpose(w_oihw, (2, 3, 1, 0)) * scale[None, None, None, :]
        w = w.astype(jnp.bfloat16).astype(jnp.float32)
        inp = inp.astype(jnp.bfloat16).astype(jnp.float32)
        return lax.conv_general_dilated(
            inp, w, window_strides=(s, s), padding=((1, 1), (1, 1)),
            dimension_numbers=("NHWC", "HWIO", "NHWC"),
            precision=lax.Precision.HIGHEST)

    s1, b1 = _fold_bn(*params["bn1"])
    s2, b2 = _fold_bn(*params["bn2"])
    out1 = jnp.maximum(conv3x3(x, params["conv1_w"], s1, stride) + b1, 0.0)
    out2 = conv3x3(out1, params["conv2_w"], s2, 1) + b2
    if stride != 1 or in_planes != planes:
        sc = x[:, ::2, ::2, :]
        pad_c = planes // 4
        sc = jnp.pad(sc, ((0, 0), (0, 0), (0, 0), (pad_c, pad_c)))
    else:
        sc = x
    out = jnp.maximum(out2 + sc, 0.0)
    return jnp.transpose(out, (0, 3, 1, 2))


# ----------------------------------------------------------------------------
# Deterministic parameter construction
# ----------------------------------------------------------------------------
def make_params(key, in_planes, planes):
    ks = jax.random.split(key, 4)

    def bn_params(k, c):
        k1, k2, k3, k4 = jax.random.split(k, 4)
        gamma = 0.5 + jax.random.uniform(k1, (c,), jnp.float32)
        beta = 0.1 * jax.random.normal(k2, (c,), jnp.float32)
        rmean = 0.1 * jax.random.normal(k3, (c,), jnp.float32)
        rvar = 0.5 + jax.random.uniform(k4, (c,), jnp.float32)
        return (gamma, beta, rmean, rvar)

    return {
        "conv1_w": 0.1 * jax.random.normal(
            ks[0], (planes, in_planes, 3, 3), jnp.float32),
        "bn1": bn_params(ks[1], planes),
        "conv2_w": 0.1 * jax.random.normal(
            ks[2], (planes, planes, 3, 3), jnp.float32),
        "bn2": bn_params(ks[3], planes),
    }


# ----------------------------------------------------------------------------
# Main
# ----------------------------------------------------------------------------
if __name__ == "__main__":
    key = jax.random.PRNGKey(0)
    k1, k2, k3, k4 = jax.random.split(key, 4)

    # Case 1: downsampling block (stride 2, option-A zero-padding shortcut).
    in_planes, planes, stride = 4, 8, 2
    N, H, W = 2, 16, 16
    x = jax.random.normal(k1, (N, in_planes, H, W), jnp.float32)
    params = make_params(k2, in_planes, planes)
    fwd = jax.jit(functools.partial(basic_block_forward, stride=stride,
                                    in_planes=in_planes, planes=planes))
    out = jax.block_until_ready(fwd(x, params))
    ref = basic_block_reference(x, params, stride=stride,
                                in_planes=in_planes, planes=planes)
    assert out.shape == (N, planes, H // 2, W // 2), out.shape
    assert jnp.allclose(out, ref, atol=1e-2, rtol=1e-2), float(
        jnp.max(jnp.abs(out - ref)))

    # Case 2: identity block (stride 1, in_planes == planes).
    in_planes2, planes2, stride2 = 8, 8, 1
    N2, H2, W2 = 2, 8, 8
    x2 = jax.random.normal(k3, (N2, in_planes2, H2, W2), jnp.float32)
    params2 = make_params(k4, in_planes2, planes2)
    fwd2 = jax.jit(functools.partial(basic_block_forward, stride=stride2,
                                     in_planes=in_planes2, planes=planes2))
    out2 = jax.block_until_ready(fwd2(x2, params2))
    ref2 = basic_block_reference(x2, params2, stride=stride2,
                                 in_planes=in_planes2, planes=planes2)
    assert out2.shape == (N2, planes2, H2, W2), out2.shape
    assert jnp.allclose(out2, ref2, atol=1e-2, rtol=1e-2), float(
        jnp.max(jnp.abs(out2 - ref2)))

    print("KERNEL_OK")
</pallas_src>

<mosaic_0001>
module attributes {stable_mosaic.version = 11 : i64} {
  func.func @kernel(%arg0: i32, %arg1: memref<1x96x16xf32, #tpu.memory_space<vmem>>, %arg2: memref<4x16x128xbf16, #tpu.memory_space<vmem>>, %arg3: memref<1x128xf32, #tpu.memory_space<vmem>>, %arg4: memref<80x1xf32, #tpu.memory_space<vmem>>, %arg5: memref<9x128x128xbf16, #tpu.memory_space<vmem>>, %arg6: memref<1x8xf32, #tpu.memory_space<vmem>>, %arg7: memref<1x80x8xf32, #tpu.memory_space<vmem>>, %arg8: memref<1x80x8xf32, #tpu.memory_space<vmem>>, %arg9: memref<112x128xf32, #tpu.memory_space<vmem>>) attributes {dimension_semantics = [#tpu.dimension_semantics<parallel>], iteration_bounds = array<i64: 2>, scalar_prefetch = 0 : i64, scratch_operands = 1 : i64, tpu.core_type = #tpu.core_type<tc>, window_params = [{transform_indices = @transform_0, window_bounds = array<i64: 1, 96, 16>}, {pipeline_mode = #tpu.pipeline_mode<synchronous>, transform_indices = @transform_1, window_bounds = array<i64: 4, 16, 128>}, {pipeline_mode = #tpu.pipeline_mode<synchronous>, transform_indices = @transform_2, window_bounds = array<i64: 1, 128>}, {pipeline_mode = #tpu.pipeline_mode<synchronous>, transform_indices = @transform_3, window_bounds = array<i64: 80, 1>}, {pipeline_mode = #tpu.pipeline_mode<synchronous>, transform_indices = @transform_4, window_bounds = array<i64: 9, 128, 128>}, {pipeline_mode = #tpu.pipeline_mode<synchronous>, transform_indices = @transform_5, window_bounds = array<i64: 1, 8>}, {transform_indices = @transform_6, window_bounds = array<i64: 1, 80, 8>}, {transform_indices = @transform_7, window_bounds = array<i64: 1, 80, 8>}]} {
    %c0 = arith.constant 0 : index
    %c0_0 = arith.constant 0 : index
    %c0_1 = arith.constant 0 : index
    %0 = vector.load %arg7[%c0, %c0_0, %c0_1] : memref<1x80x8xf32, #tpu.memory_space<vmem>>, vector<1x80x8xf32>
    %1 = vector.shape_cast %0 : vector<1x80x8xf32> to vector<80x8xf32>
    %cst = arith.constant 0.000000e+00 : f32
    %2 = vector.broadcast %cst : f32 to vector<80x128xf32>
    %c0_2 = arith.constant 0 : index
    %c0_3 = arith.constant 0 : index
    %c0_4 = arith.constant 0 : index
    %3 = vector.load %arg1[%c0_2, %c0_3, %c0_4] : memref<1x96x16xf32, #tpu.memory_space<vmem>>, vector<1x80x16xf32>
    %4 = vector.shape_cast %3 : vector<1x80x16xf32> to vector<80x16xf32>
    %5 = arith.truncf %4 : vector<80x16xf32> to vector<80x16xbf16>
    %c0_5 = arith.constant 0 : index
    %c0_6 = arith.constant 0 : index
    %c0_7 = arith.constant 0 : index
    %6 = vector.load %arg2[%c0_5, %c0_6, %c0_7] : memref<4x16x128xbf16, #tpu.memory_space<vmem>>, vector<1x16x128xbf16>
    %7 = vector.shape_cast %6 : vector<1x16x128xbf16> to vector<16x128xbf16>
    %cst_8 = arith.constant dense<0.000000e+00> : vector<80x128xf32>
    %8 = tpu.matmul %5, %7, %cst_8 {dimension_numbers = #tpu.dot_dimension_numbers<[1], [0], [0], [1], [0, 0, 1, 1], [], []>} : vector<80x16xbf16>, vector<16x128xbf16>, vector<80x128xf32> -> vector<80x128xf32>
    %9 = arith.addf %2, %8 : vector<80x128xf32>
    %c0_9 = arith.constant 0 : index
    %c1 = arith.constant 1 : index
    %c0_10 = arith.constant 0 : index
    %10 = vector.load %arg1[%c0_9, %c1, %c0_10] : memref<1x96x16xf32, #tpu.memory_space<vmem>>, vector<1x80x16xf32>
    %11 = vector.shape_cast %10 : vector<1x80x16xf32> to vector<80x16xf32>
    %12 = arith.truncf %11 : vector<80x16xf32> to vector<80x16xbf16>
    %c1_11 = arith.constant 1 : index
    %c0_12 = arith.constant 0 : index
    %c0_13 = arith.constant 0 : index
    %13 = vector.load %arg2[%c1_11, %c0_12, %c0_13] : memref<4x16x128xbf16, #tpu.memory_space<vmem>>, vector<1x16x128xbf16>
    %14 = vector.shape_cast %13 : vector<1x16x128xbf16> to vector<16x128xbf16>
    %cst_14 = arith.constant dense<0.000000e+00> : vector<80x128xf32>
    %15 = tpu.matmul %12, %14, %cst_14 {dimension_numbers = #tpu.dot_dimension_numbers<[1], [0], [0], [1], [0, 0, 1, 1], [], []>} : vector<80x16xbf16>, vector<16x128xbf16>, vector<80x128xf32> -> vector<80x128xf32>
    %16 = arith.addf %9, %15 : vector<80x128xf32>
    %c0_15 = arith.constant 0 : index
    %c10 = arith.constant 10 : index
    %c0_16 = arith.constant 0 : index
    %17 = vector.load %arg1[%c0_15, %c10, %c0_16] : memref<1x96x16xf32, #tpu.memory_space<vmem>>, vector<1x80x16xf32>
    %18 = vector.shape_cast %17 : vector<1x80x16xf32> to vector<80x16xf32>
    %19 = arith.truncf %18 : vector<80x16xf32> to vector<80x16xbf16>
    %c2 = arith.constant 2 : index
    %c0_17 = arith.constant 0 : index
    %c0_18 = arith.constant 0 : index
    %20 = vector.load %arg2[%c2, %c0_17, %c0_18] : memref<4x16x128xbf16, #tpu.memory_space<vmem>>, vector<1x16x128xbf16>
    %21 = vector.shape_cast %20 : vector<1x16x128xbf16> to vector<16x128xbf16>
    %cst_19 = arith.constant dense<0.000000e+00> : vector<80x128xf32>
    %22 = tpu.matmul %19, %21, %cst_19 {dimension_numbers = #tpu.dot_dimension_numbers<[1], [0], [0], [1], [0, 0, 1, 1], [], []>} : vector<80x16xbf16>, vector<16x128xbf16>, vector<80x128xf32> -> vector<80x128xf32>
    %23 = arith.addf %16, %22 : vector<80x128xf32>
    %c0_20 = arith.constant 0 : index
    %c11 = arith.constant 11 : index
    %c0_21 = arith.constant 0 : index
    %24 = vector.load %arg1[%c0_20, %c11, %c0_21] : memref<1x96x16xf32, #tpu.memory_space<vmem>>, vector<1x80x16xf32>
    %25 = vector.shape_cast %24 : vector<1x80x16xf32> to vector<80x16xf32>
    %26 = arith.truncf %25 : vector<80x16xf32> to vector<80x16xbf16>
    %c3 = arith.constant 3 : index
    %c0_22 = arith.constant 0 : index
    %c0_23 = arith.constant 0 : index
    %27 = vector.load %arg2[%c3, %c0_22, %c0_23] : memref<4x16x128xbf16, #tpu.memory_space<vmem>>, vector<1x16x128xbf16>
    %28 = vector.shape_cast %27 : vector<1x16x128xbf16> to vector<16x128xbf16>
    %cst_24 = arith.constant dense<0.000000e+00> : vector<80x128xf32>
    %29 = tpu.matmul %26, %28, %cst_24 {dimension_numbers = #tpu.dot_dimension_numbers<[1], [0], [0], [1], [0, 0, 1, 1], [], []>} : vector<80x16xbf16>, vector<16x128xbf16>, vector<80x128xf32> -> vector<80x128xf32>
    %30 = arith.addf %23, %29 : vector<80x128xf32>
    %c0_25 = arith.constant 0 : index
    %c0_26 = arith.constant 0 : index
    %31 = vector.load %arg3[%c0_25, %c0_26] : memref<1x128xf32, #tpu.memory_space<vmem>>, vector<1x128xf32>
    %32 = vector.broadcast %31 : vector<1x128xf32> to vector<80x128xf32>
    %33 = arith.addf %30, %32 : vector<80x128xf32>
    %cst_27 = arith.constant 0.000000e+00 : f32
    %34 = vector.broadcast %cst_27 : f32 to vector<80x128xf32>
    %35 = arith.maximumf %33, %34 : vector<80x128xf32>
    %c0_28 = arith.constant 0 : index
    %c0_29 = arith.constant 0 : index
    %36 = vector.load %arg4[%c0_28, %c0_29] : memref<80x1xf32, #tpu.memory_space<vmem>>, vector<80x1xf32>
    %37 = vector.broadcast %36 : vector<80x1xf32> to vector<80x128xf32>
    %38 = arith.mulf %35, %37 : vector<80x128xf32>
    %cst_30 = arith.constant 0.000000e+00 : f32
    %39 = vector.broadcast %cst_30 : f32 to vector<112x128xf32>
    %c0_31 = arith.constant 0 : index
    %c0_32 = arith.constant 0 : index
    %40 = vector.load %arg9[%c0_31, %c0_32] : memref<112x128xf32, #tpu.memory_space<vmem>>, vector<112x128xf32>
    tpu.vector_store %arg9[%c0_31, %c0_32], %39 {strides = array<i32>} : memref<112x128xf32, #tpu.memory_space<vmem>>, vector<112x128xf32>,
    %c16 = arith.constant 16 : index
    %c0_33 = arith.constant 0 : index
    %41 = vector.load %arg9[%c16, %c0_33] : memref<112x128xf32, #tpu.memory_space<vmem>>, vector<80x128xf32>
    tpu.vector_store %arg9[%c16, %c0_33], %38 {strides = array<i32>} : memref<112x128xf32, #tpu.memory_space<vmem>>, vector<80x128xf32>,
    %cst_34 = arith.constant 0.000000e+00 : f32
    %42 = vector.broadcast %cst_34 : f32 to vector<80x128xf32>
    %c5 = arith.constant 5 : index
    %c0_35 = arith.constant 0 : index
    %43 = vector.load %arg9[%c5, %c0_35] : memref<112x128xf32, #tpu.memory_space<vmem>>, vector<80x128xf32>
    %44 = arith.truncf %43 : vector<80x128xf32> to vector<80x128xbf16>
    %c0_36 = arith.constant 0 : index
    %c0_37 = arith.constant 0 : index
    %c0_38 = arith.constant 0 : index
    %45 = vector.load %arg5[%c0_36, %c0_37, %c0_38] : memref<9x128x128xbf16, #tpu.memory_space<vmem>>, vector<1x128x128xbf16>
    %46 = vector.shape_cast %45 : vector<1x128x128xbf16> to vector<128x128xbf16>
    %cst_39 = arith.constant dense<0.000000e+00> : vector<80x128xf32>
    %47 = tpu.matmul %44, %46, %cst_39 {dimension_numbers = #tpu.dot_dimension_numbers<[1], [0], [0], [1], [0, 0, 1, 1], [], []>} : vector<80x128xbf16>, vector<128x128xbf16>, vector<80x128xf32> -> vector<80x128xf32>
    %48 = arith.addf %42, %47 : vector<80x128xf32>
    %c6 = arith.constant 6 : index
    %c0_40 = arith.constant 0 : index
    %49 = vector.load %arg9[%c6, %c0_40] : memref<112x128xf32, #tpu.memory_space<vmem>>, vector<80x128xf32>
    %50 = arith.truncf %49 : vector<80x128xf32> to vector<80x128xbf16>
    %c1_41 = arith.constant 1 : index
    %c0_42 = arith.constant 0 : index
    %c0_43 = arith.constant 0 : index
    %51 = vector.load %arg5[%c1_41, %c0_42, %c0_43] : memref<9x128x128xbf16, #tpu.memory_space<vmem>>, vector<1x128x128xbf16>
    %52 = vector.shape_cast %51 : vector<1x128x128xbf16> to vector<128x128xbf16>
    %cst_44 = arith.constant dense<0.000000e+00> : vector<80x128xf32>
    %53 = tpu.matmul %50, %52, %cst_44 {dimension_numbers = #tpu.dot_dimension_numbers<[1], [0], [0], [1], [0, 0, 1, 1], [], []>} : vector<80x128xbf16>, vector<128x128xbf16>, vector<80x128xf32> -> vector<80x128xf32>
    %54 = arith.addf %48, %53 : vector<80x128xf32>
    %c7 = arith.constant 7 : index
    %c0_45 = arith.constant 0 : index
    %55 = vector.load %arg9[%c7, %c0_45] : memref<112x128xf32, #tpu.memory_space<vmem>>, vector<80x128xf32>
    %56 = arith.truncf %55 : vector<80x128xf32> to vector<80x128xbf16>
    %c2_46 = arith.constant 2 : index
    %c0_47 = arith.constant 0 : index
    %c0_48 = arith.constant 0 : index
    %57 = vector.load %arg5[%c2_46, %c0_47, %c0_48] : memref<9x128x128xbf16, #tpu.memory_space<vmem>>, vector<1x128x128xbf16>
    %58 = vector.shape_cast %57 : vector<1x128x128xbf16> to vector<128x128xbf16>
    %cst_49 = arith.constant dense<0.000000e+00> : vector<80x128xf32>
    %59 = tpu.matmul %56, %58, %cst_49 {dimension_numbers = #tpu.dot_dimension_numbers<[1], [0], [0], [1], [0, 0, 1, 1], [], []>} : vector<80x128xbf16>, vector<128x128xbf16>, vector<80x128xf32> -> vector<80x128xf32>
    %60 = arith.addf %54, %59 : vector<80x128xf32>
    %c15 = arith.constant 15 : index
    %c0_50 = arith.constant 0 : index
    %61 = vector.load %arg9[%c15, %c0_50] : memref<112x128xf32, #tpu.memory_space<vmem>>, vector<80x128xf32>
    %62 = arith.truncf %61 : vector<80x128xf32> to vector<80x128xbf16>
    %c3_51 = arith.constant 3 : index
    %c0_52 = arith.constant 0 : index
    %c0_53 = arith.constant 0 : index
    %63 = vector.load %arg5[%c3_51, %c0_52, %c0_53] : memref<9x128x128xbf16, #tpu.memory_space<vmem>>, vector<1x128x128xbf16>
    %64 = vector.shape_cast %63 : vector<1x128x128xbf16> to vector<128x128xbf16>
    %cst_54 = arith.constant dense<0.000000e+00> : vector<80x128xf32>
    %65 = tpu.matmul %62, %64, %cst_54 {dimension_numbers = #tpu.dot_dimension_numbers<[1], [0], [0], [1], [0, 0, 1, 1], [], []>} : vector<80x128xbf16>, vector<128x128xbf16>, vector<80x128xf32> -> vector<80x128xf32>
    %66 = arith.addf %60, %65 : vector<80x128xf32>
    %c16_55 = arith.constant 16 : index
    %c0_56 = arith.constant 0 : index
    %67 = vector.load %arg9[%c16_55, %c0_56] : memref<112x128xf32, #tpu.memory_space<vmem>>, vector<80x128xf32>
    %68 = arith.truncf %67 : vector<80x128xf32> to vector<80x128xbf16>
    %c4 = arith.constant 4 : index
    %c0_57 = arith.constant 0 : index
    %c0_58 = arith.constant 0 : index
    %69 = vector.load %arg5[%c4, %c0_57, %c0_58] : memref<9x128x128xbf16, #tpu.memory_space<vmem>>, vector<1x128x128xbf16>
    %70 = vector.shape_cast %69 : vector<1x128x128xbf16> to vector<128x128xbf16>
    %cst_59 = arith.constant dense<0.000000e+00> : vector<80x128xf32>
    %71 = tpu.matmul %68, %70, %cst_59 {dimension_numbers = #tpu.dot_dimension_numbers<[1], [0], [0], [1], [0, 0, 1, 1], [], []>} : vector<80x128xbf16>, vector<128x128xbf16>, vector<80x128xf32> -> vector<80x128xf32>
    %72 = arith.addf %66, %71 : vector<80x128xf32>
    %c17 = arith.constant 17 : index
    %c0_60 = arith.constant 0 : index
    %73 = vector.load %arg9[%c17, %c0_60] : memref<112x128xf32, #tpu.memory_space<vmem>>, vector<80x128xf32>
    %74 = arith.truncf %73 : vector<80x128xf32> to vector<80x128xbf16>
    %c5_61 = arith.constant 5 : index
    %c0_62 = arith.constant 0 : index
    %c0_63 = arith.constant 0 : index
    %75 = vector.load %arg5[%c5_61, %c0_62, %c0_63] : memref<9x128x128xbf16, #tpu.memory_space<vmem>>, vector<1x128x128xbf16>
    %76 = vector.shape_cast %75 : vector<1x128x128xbf16> to vector<128x128xbf16>
    %cst_64 = arith.constant dense<0.000000e+00> : vector<80x128xf32>
    %77 = tpu.matmul %74, %76, %cst_64 {dimension_numbers = #tpu.dot_dimension_numbers<[1], [0], [0], [1], [0, 0, 1, 1], [], []>} : vector<80x128xbf16>, vector<128x128xbf16>, vector<80x128xf32> -> vector<80x128xf32>
    %78 = arith.addf %72, %77 : vector<80x128xf32>
    %c25 = arith.constant 25 : index
    %c0_65 = arith.constant 0 : index
    %79 = vector.load %arg9[%c25, %c0_65] : memref<112x128xf32, #tpu.memory_space<vmem>>, vector<80x128xf32>
    %80 = arith.truncf %79 : vector<80x128xf32> to vector<80x128xbf16>
    %c6_66 = arith.constant 6 : index
    %c0_67 = arith.constant 0 : index
    %c0_68 = arith.constant 0 : index
    %81 = vector.load %arg5[%c6_66, %c0_67, %c0_68] : memref<9x128x128xbf16, #tpu.memory_space<vmem>>, vector<1x128x128xbf16>
    %82 = vector.shape_cast %81 : vector<1x128x128xbf16> to vector<128x128xbf16>
    %cst_69 = arith.constant dense<0.000000e+00> : vector<80x128xf32>
    %83 = tpu.matmul %80, %82, %cst_69 {dimension_numbers = #tpu.dot_dimension_numbers<[1], [0], [0], [1], [0, 0, 1, 1], [], []>} : vector<80x128xbf16>, vector<128x128xbf16>, vector<80x128xf32> -> vector<80x128xf32>
    %84 = arith.addf %78, %83 : vector<80x128xf32>
    %c26 = arith.constant 26 : index
    %c0_70 = arith.constant 0 : index
    %85 = vector.load %arg9[%c26, %c0_70] : memref<112x128xf32, #tpu.memory_space<vmem>>, vector<80x128xf32>
    %86 = arith.truncf %85 : vector<80x128xf32> to vector<80x128xbf16>
    %c7_71 = arith.constant 7 : index
    %c0_72 = arith.constant 0 : index
    %c0_73 = arith.constant 0 : index
    %87 = vector.load %arg5[%c7_71, %c0_72, %c0_73] : memref<9x128x128xbf16, #tpu.memory_space<vmem>>, vector<1x128x128xbf16>
    %88 = vector.shape_cast %87 : vector<1x128x128xbf16> to vector<128x128xbf16>
    %cst_74 = arith.constant dense<0.000000e+00> : vector<80x128xf32>
    %89 = tpu.matmul %86, %88, %cst_74 {dimension_numbers = #tpu.dot_dimension_numbers<[1], [0], [0], [1], [0, 0, 1, 1], [], []>} : vector<80x128xbf16>, vector<128x128xbf16>, vector<80x128xf32> -> vector<80x128xf32>
    %90 = arith.addf %84, %89 : vector<80x128xf32>
    %c27 = arith.constant 27 : index
    %c0_75 = arith.constant 0 : index
    %91 = vector.load %arg9[%c27, %c0_75] : memref<112x128xf32, #tpu.memory_space<vmem>>, vector<80x128xf32>
    %92 = arith.truncf %91 : vector<80x128xf32> to vector<80x128xbf16>
    %c8 = arith.constant 8 : index
    %c0_76 = arith.constant 0 : index
    %c0_77 = arith.constant 0 : index
    %93 = vector.load %arg5[%c8, %c0_76, %c0_77] : memref<9x128x128xbf16, #tpu.memory_space<vmem>>, vector<1x128x128xbf16>
    %94 = vector.shape_cast %93 : vector<1x128x128xbf16> to vector<128x128xbf16>
    %cst_78 = arith.constant dense<0.000000e+00> : vector<80x128xf32>
    %95 = tpu.matmul %92, %94, %cst_78 {dimension_numbers = #tpu.dot_dimension_numbers<[1], [0], [0], [1], [0, 0, 1, 1], [], []>} : vector<80x128xbf16>, vector<128x128xbf16>, vector<80x128xf32> -> vector<80x128xf32>
    %96 = arith.addf %90, %95 : vector<80x128xf32>
    %97 = vector.extract_strided_slice %96 {offsets = [0, 0], sizes = [80, 8], strides = [1, 1]} : vector<80x128xf32> to vector<80x8xf32>
    %c0_79 = arith.constant 0 : index
    %c0_80 = arith.constant 0 : index
    %98 = vector.load %arg6[%c0_79, %c0_80] : memref<1x8xf32, #tpu.memory_space<vmem>>, vector<1x8xf32>
    %99 = vector.broadcast %98 : vector<1x8xf32> to vector<80x8xf32>
    %100 = arith.addf %97, %99 : vector<80x8xf32>
    %101 = arith.addf %100, %1 : vector<80x8xf32>
    %cst_81 = arith.constant 0.000000e+00 : f32
    %102 = vector.broadcast %cst_81 : f32 to vector<80x8xf32>
    %103 = arith.maximumf %101, %102 : vector<80x8xf32>
    %c0_82 = arith.constant 0 : index
    %c0_83 = arith.constant 0 : index
    %c0_84 = arith.constant 0 : index
    %104 = vector.load %arg8[%c0_82, %c0_83, %c0_84] : memref<1x80x8xf32, #tpu.memory_space<vmem>>, vector<1x80x8xf32>
    %105 = vector.shape_cast %104 : vector<1x80x8xf32> to vector<80x8xf32>
    %106 = vector.shape_cast %103 : vector<80x8xf32> to vector<1x80x8xf32>
    tpu.vector_store %arg8[%c0_82, %c0_83, %c0_84], %106 {strides = array<i32>} : memref<1x80x8xf32, #tpu.memory_space<vmem>>, vector<1x80x8xf32>,
    return
  }
  func.func @transform_0(%arg0: i32) -> (i32, i32, i32) {
    %c0_i32 = arith.constant 0 : i32
    %c0_i32_0 = arith.constant 0 : i32
    %c0_i32_1 = arith.constant 0 : i32
    return %arg0, %c0_i32, %c0_i32_0 : i32, i32, i32
  }
  func.func @transform_1(%arg0: i32) -> (i32, i32, i32) {
    %c0_i32 = arith.constant 0 : i32
    %c0_i32_0 = arith.constant 0 : i32
    %c0_i32_1 = arith.constant 0 : i32
    %c0_i32_2 = arith.constant 0 : i32
    return %c0_i32, %c0_i32_0, %c0_i32_1 : i32, i32, i32
  }
  func.func @transform_2(%arg0: i32) -> (i32, i32) {
    %c0_i32 = arith.constant 0 : i32
    %c0_i32_0 = arith.constant 0 : i32
    %c0_i32_1 = arith.constant 0 : i32
    return %c0_i32, %c0_i32_0 : i32, i32
  }
  func.func @transform_3(%arg0: i32) -> (i32, i32) {
    %c0_i32 = arith.constant 0 : i32
    %c0_i32_0 = arith.constant 0 : i32
    %c0_i32_1 = arith.constant 0 : i32
    return %c0_i32, %c0_i32_0 : i32, i32
  }
  func.func @transform_4(%arg0: i32) -> (i32, i32, i32) {
    %c0_i32 = arith.constant 0 : i32
    %c0_i32_0 = arith.constant 0 : i32
    %c0_i32_1 = arith.constant 0 : i32
    %c0_i32_2 = arith.constant 0 : i32
    return %c0_i32, %c0_i32_0, %c0_i32_1 : i32, i32, i32
  }
  func.func @transform_5(%arg0: i32) -> (i32, i32) {
    %c0_i32 = arith.constant 0 : i32
    %c0_i32_0 = arith.constant 0 : i32
    %c0_i32_1 = arith.constant 0 : i32
    return %c0_i32, %c0_i32_0 : i32, i32
  }
  func.func @transform_6(%arg0: i32) -> (i32, i32, i32) {
    %c0_i32 = arith.constant 0 : i32
    %c0_i32_0 = arith.constant 0 : i32
    %c0_i32_1 = arith.constant 0 : i32
    return %arg0, %c0_i32, %c0_i32_0 : i32, i32, i32
  }
  func.func @transform_7(%arg0: i32) -> (i32, i32, i32) {
    %c0_i32 = arith.constant 0 : i32
    %c0_i32_0 = arith.constant 0 : i32
    %c0_i32_1 = arith.constant 0 : i32
    return %arg0, %c0_i32, %c0_i32_0 : i32, i32, i32
  }
}

</mosaic_0001>

<bundles_post_ra>
// kernel: basic_block_forward.1
= control target key start
LH: loop header
LB: loop body
LE: loop exit
PB: predicated region body
PF: predicated region fallthrough
CT: control target
= control target key end

     0   :  { %s3400_s24 = smov 0   ;;  %s4147_s0 = inlined_call_operand.vmem [shape: f32[2,96,16], index: 0, kind: input, shape index: {}]   ;;  %s4148_s1 = inlined_call_operand.vmem [shape: bf16[4,16,128], index: 1, kind: input, shape index: {}]   ;;  %s4149_s2 = inlined_call_operand.vmem [shape: f32[1,128], index: 2, kind: input, shape index: {}]   ;;  %s4150_s3 = inlined_call_operand.vmem [shape: f32[80,1], index: 3, kind: input, shape index: {}]   ;;  %s4151_s4 = inlined_call_operand.vmem [shape: bf16[9,128,128], index: 4, kind: input, shape index: {}]   ;;  %s4152_s5 = inlined_call_operand.vmem [shape: f32[1,8], index: 5, kind: input, shape index: {}]   ;;  %s4153_s6 = inlined_call_operand.vmem [shape: f32[2,80,8], index: 6, kind: input, shape index: {}]   ;;  %s4154_s7 = inlined_call_operand.vmem [shape: f32[2,80,8], index: 7, kind: output, shape index: {}]  }
   0x1 LB: > { %s2460_s25 = sadd.s32 4294967295, %s3355_s24   ;;  %p2464_p0 = scmp.ge.s32.totalorder %s3355_s24, 1  ;;  %s3355_s24 = sphi %s3400_s24, %s17_s24  }
   0x2   : > { %p247_p1 = scmp.lt.s32.totalorder %s3355_s24, 3 }
   0x4   : > { %p248_p2 = pnand %p2464_p0, %p247_p1 }
   0x5   : > { %v3272_v0 = vld [vmem:[%s4148_s1 + $0x8] sm:$0xff] (!%p248_p2)   ;;  %v3357_v1 = vmov (!%p248_p2), 0.0   ;;  %p284_p3 = scmp.lt.s32.totalorder (!%p248_p2), %s2460_s25, 1  ;;  %vm3358_vm0 = vmmov (!%p248_p2), 0   ;;  %v805_v2 = vld [vmem:[%s4150_s3] sm:$0xff] (!%p248_p2)  ;;  %v3359_v3 = vmov (!%p248_p2), 0  }
   0x6   : > { %251 = sbr.rel (%p248_p2) target bundleno = 722 (0x2d2), region = 48  ;;  %3255 = vmatprep.subr.bf16.mxu1 (!%p248_p2), %v3357_v1  ;;  %875 = vst [vmem:[#allocation2] sm:$0xff] (!%p248_p2), %v3357_v1  ;;  %876 = vst [vmem:[#allocation2 + $0x8] sm:$0xff] (!%p248_p2), %v3357_v1  ;;  %2843 = vmatprep.subr.bf16.mxu0 (!%p248_p2), %v3357_v1  ;;  %v807_v4 = vld [vmem:[%s4150_s3 + $0x10] sm:$0xff] (!%p248_p2)  ;;  %v806_v5 = vld [vmem:[%s4150_s3 + $0x8] sm:$0xff] (!%p248_p2)  ;;  %vm351_vm1 = vcmask (!%p248_p2), 130048  }
   0x7   : > { %887 = vst [vmem:[#allocation2 + $0x60] sm:$0xff] (!%p248_p2), %v3357_v1  ;;  %888 = vst [vmem:[#allocation2 + $0x68] sm:$0xff] (!%p248_p2), %v3357_v1  ;;  %3256 = vmatpush3.bf16.msra.mxu1 (!%p248_p2), %v3272_v0  ;;  %2844 = vmatpush3.bf16.msra.mxu0 (!%p248_p2), %v3272_v0  ;;  %v808_v6 = vld [vmem:[%s4150_s3 + $0x18] sm:$0xff] (!%p248_p2)  ;;  %v3273_v12 = vld [vmem:[%s4148_s1] sm:$0xff] (!%p248_p2)   ;;  %vm2382_vm2 = vcmask (!%p248_p2), 64512  }
   0x8   : > { %2845 = vmatprep.mubr.msk.bf16.mxu0 (!%p248_p2), %vm3358_vm0, %v3357_v1  ;;  %2857 = vmatprep.mubr.msk.bf16.mxu1 (!%p248_p2), %vm3358_vm0, %v3357_v1  ;;  %v3275_v14 = vld [vmem:[%s4148_s1 + $0x10] sm:$0xff] (!%p248_p2)   ;;  %v809_v15 = vld [vmem:[%s4150_s3 + $0x20] sm:$0xff] (!%p248_p2)  ;;  %v810_v18 = vld [vmem:[%s4150_s3 + $0x28] sm:$0xff] (!%p248_p2) }
   0x9   : > { %2865 = vmatprep.subr.bf16.mxu1 (!%p248_p2), %v3357_v1  ;;  %2887 = vmatprep.subr.bf16.mxu0 (!%p248_p2), %v3357_v1  ;;  %v811_v23 = vld [vmem:[%s4150_s3 + $0x30] sm:$0xff] (!%p248_p2)  ;;  %v812_v24 = vld [vmem:[%s4150_s3 + $0x38] sm:$0xff] (!%p248_p2)  ;;  %v813_v25 = vld [vmem:[%s4150_s3 + $0x40] sm:$0xff] (!%p248_p2) }
   0xa   : > { %3270 = vset.pattern.permute.xlu0 (!%p248_p2), %v3359_v3  ;;  %3271 = vset.pattern.permute.xlu1 (!%p248_p2), %v3359_v3  ;;  %v814_v29 = vld [vmem:[%s4150_s3 + $0x48] sm:$0xff] (!%p248_p2)  ;;  %v3274_v32 = vld [vmem:[%s4148_s1 + $0x18] sm:$0xff] (!%p248_p2)  }
   0xb   : > { %817 = vperm.xlu0 (!%p248_p2), %3270, %v805_v2   ;;  %827 = vperm.xlu1 (!%p248_p2), %3271, %v807_v4  }
   0xd   : > { %s4156_s25 = smov (!%p284_p3, %s2460_s25), 1 }
   0xe   : > { %s3257_s30 = smul.u32 96, %s4156_s25 }
   0xf   : > { %822 = vperm.xlu0 %3270, %v806_v5   ;;  %832 = vperm.xlu1 %3271, %v808_v6   ;;  %s3258_s14 = smul.u32 80, %s4156_s25 }
  0x10   : > { %s3435_s12 = scalar_lea.vmem %s4147_s0, %s3257_s30 }
  0x11   : > { %v327_v7 = vld [vmem:[%s3435_s12 + $0x1] sm:$0xff]  ;;  %v328_v8 = vld [vmem:[%s3435_s12 + $0x9] sm:$0xff]  ;;  %v333_v9 = vld [vmem:[%s3435_s12 + $0x31] sm:$0xff]  ;;  %s4085_s17 = scalar_lea.vmem %s4153_s6, %s3258_s14 }
  0x12   : > { %v337_v10 = vpack.c.bf16 %v328_v8, %v327_v7  ;;  %v334_v11 = vld [vmem:[%s3435_s12 + $0x39] sm:$0xff]  ;;  %v329_v16 = vld [vmem:[%s3435_s12 + $0x11] sm:$0xff]  ;;  %v335_v19 = vld [vmem:[%s3435_s12 + $0x41] sm:$0xff] }
  0x13   : > { %v340_v13 = vpack.c.bf16 %v334_v11, %v333_v9  ;;  %v330_v17 = vld [vmem:[%s3435_s12 + $0x19] sm:$0xff]  ;;  %v336_v20 = vld [vmem:[%s3435_s12 + $0x49] sm:$0xff]  ;;  %837 = vperm.xlu0 %3270, %v809_v15   ;;  %842 = vperm.xlu1 %3271, %v810_v18   ;;  %v331_v26 = vld [vmem:[%s3435_s12 + $0x21] sm:$0xff] }
  0x14   : > { %2846 = vmatmul.mubr.msk.bf16.vlgmr.msra.gmra.mrb[0].mxu0 %vm351_vm1, %v337_v10  ;;  %v338_v21 = vpack.c.bf16 %v330_v17, %v329_v16  ;;  %v341_v22 = vpack.c.bf16 %v336_v20, %v335_v19  ;;  %v332_v27 = vld [vmem:[%s3435_s12 + $0x29] sm:$0xff]  ;;  %v310_v28 = vld [vmem:[%s3435_s12] sm:$0xff]  ;;  %v535_v35 = vld [vmem:[%s3435_s12 + $0x12] sm:$0xff] }
  0x15   : > { %2858 = vmatmul.mubr.msk.bf16.vlgmr.msra.gmra.mrb[0].mxu1 %vm351_vm1, %v340_v13  ;;  %2849 = vmatprep.mubr.msk.bf16.mxu0 %vm3358_vm0, %v3357_v1  ;;  %v311_v30 = vld [vmem:[%s3435_s12 + $0x8] sm:$0xff]  ;;  %v339_v31 = vpack.c.bf16 %v332_v27, %v331_v26  ;;  %v312_v36 = vld [vmem:[%s3435_s12 + $0x10] sm:$0xff]  ;;  %v313_v37 = vld [vmem:[%s3435_s12 + $0x18] sm:$0xff] }
  0x16   : > { %2866 = vmatpush3.bf16.msra.mxu1 %v3273_v12  ;;  %2861 = vmatprep.mubr.msk.bf16.mxu1 %vm3358_vm0, %v3357_v1  ;;  %v320_v33 = vpack.c.bf16 %v311_v30, %v310_v28  ;;  %v534_v34 = vld [vmem:[%s3435_s12 + $0xa] sm:$0xff]  ;;  %v321_v39 = vpack.c.bf16 %v313_v37, %v312_v36  ;;  %v536_v40 = vld [vmem:[%s3435_s12 + $0x1a] sm:$0xff]  ;;  %v537_v41 = vld [vmem:[%s3435_s12 + $0x22] sm:$0xff] }
  0x17   : > { %2909 = vmatprep.subr.bf16.mxu1 %v3357_v1  ;;  %2888 = vmatpush3.bf16.msra.mxu0 %v3275_v14  ;;  %v544_v38 = vpack.c.bf16 %v535_v35, %v534_v34  ;;  %v314_v42 = vld [vmem:[%s3435_s12 + $0x20] sm:$0xff]  ;;  %v315_v43 = vld [vmem:[%s3435_s12 + $0x28] sm:$0xff]  ;;  %v545_v44 = vpack.c.bf16 %v537_v41, %v536_v40  ;;  %v539_v47 = vld [vmem:[%s3435_s12 + $0x32] sm:$0xff] }
  0x18   : > { %2931 = vmatprep.subr.bf16.mxu0 %v3357_v1  ;;  %847 = vperm.xlu0 %3270, %v811_v23   ;;  %v322_v45 = vpack.c.bf16 %v315_v43, %v314_v42  ;;  %v538_v46 = vld [vmem:[%s3435_s12 + $0x2a] sm:$0xff]  ;;  %v317_v49 = vld [vmem:[%s3435_s12 + $0x38] sm:$0xff]  ;;  %v541_v53 = vld [vmem:[%s3435_s12 + $0x42] sm:$0xff] }
  0x19   : > { %852 = vperm.xlu1 %3271, %v812_v24   ;;  %v316_v48 = vld [vmem:[%s3435_s12 + $0x30] sm:$0xff]  ;;  %v546_v50 = vpack.c.bf16 %v539_v47, %v538_v46  ;;  %v540_v52 = vld [vmem:[%s3435_s12 + $0x3a] sm:$0xff]  ;;  %v319_v55 = vld [vmem:[%s3435_s12 + $0x48] sm:$0xff] }
  0x1a   : > { %v323_v51 = vpack.c.bf16 %v317_v49, %v316_v48  ;;  %v318_v54 = vld [vmem:[%s3435_s12 + $0x40] sm:$0xff]  ;;  %v547_v56 = vpack.c.bf16 %v541_v53, %v540_v52  ;;  %v542_v58 = vld [vmem:[%s3435_s12 + $0x4a] sm:$0xff]  ;;  %v543_v59 = vld [vmem:[%s3435_s12 + $0x52] sm:$0xff] }
  0x1b   : > { %v324_v57 = vpack.c.bf16 %v319_v55, %v318_v54  ;;  %v656_v60 = vld [vmem:[%s3435_s12 + $0xb] sm:$0xff]  ;;  %v657_v61 = vld [vmem:[%s3435_s12 + $0x13] sm:$0xff]  ;;  %v548_v62 = vpack.c.bf16 %v543_v59, %v542_v58  ;;  %v658_v0 = vld [vmem:[%s3435_s12 + $0x1b] sm:$0xff] }
  0x1c   : > { %2850 = vmatmul.mubr.msk.bf16.gmra.mrb[4].mxu0 %vm351_vm1, %v338_v21  ;;  %857 = vperm.xlu0 %3270, %v813_v25   ;;  %v666_v63 = vpack.c.bf16 %v657_v61, %v656_v60  ;;  %v659_v2 = vld [vmem:[%s3435_s12 + $0x23] sm:$0xff]  ;;  %v660_v4 = vld [vmem:[%s3435_s12 + $0x2b] sm:$0xff]  ;;  %v661_v5 = vld [vmem:[%s3435_s12 + $0x33] sm:$0xff] }
  0x1d   : > { %2862 = vmatmul.mubr.msk.bf16.gmra.mrb[4].mxu1 %vm351_vm1, %v341_v22  ;;  %2853 = vmatprep.mubr.msk.bf16.mxu0 %vm3358_vm0, %v3357_v1  ;;  %v667_v3 = vpack.c.bf16 %v659_v2, %v658_v0  ;;  %v668_v6 = vpack.c.bf16 %v661_v5, %v660_v4  ;;  %v662_v7 = vld [vmem:[%s3435_s12 + $0x3b] sm:$0xff]  ;;  %v663_v8 = vld [vmem:[%s3435_s12 + $0x43] sm:$0xff]  ;;  %v664_v10 = vld [vmem:[%s3435_s12 + $0x4b] sm:$0xff] }
  0x1e   : > { %2867 = vmatprep.mubr.msk.bf16.mxu1 %vm3358_vm0, %v3357_v1  ;;  %862 = vperm.xlu1 %3271, %v814_v29   ;;  %v669_v9 = vpack.c.bf16 %v663_v8, %v662_v7  ;;  %v665_v11 = vld [vmem:[%s3435_s12 + $0x53] sm:$0xff]  ;;  %v3276_v13 = vld [vmem:[%s4151_s4 + $0x40] sm:$0xff]   ;;  %v3277_v14 = vld [vmem:[%s4151_s4 + $0x48] sm:$0xff]   ;;  %s4099_s12 = scalar_lea.vmem %s4154_s7, %s3258_s14 }
  0x1f   : > { %v670_v12 = vpack.c.bf16 %v665_v11, %v664_v10  ;;  %v3278_v15 = vld [vmem:[%s4151_s4] sm:$0xff]   ;;  %v3279_v16 = vld [vmem:[%s4151_s4 + $0x50] sm:$0xff]   ;;  %v3280_v17 = vld [vmem:[%s4151_s4 + $0x8] sm:$0xff]  }
  0x20   : > { %v3282_v18 = vld [vmem:[%s4151_s4 + $0x10] sm:$0xff]   ;;  %v3281_v19 = vld [vmem:[%s4151_s4 + $0x58] sm:$0xff]   ;;  %v3283_v20 = vld [vmem:[%s4151_s4 + $0x60] sm:$0xff]  }
  0x21   : > { %v3284_v21 = vld [vmem:[%s4151_s4 + $0x18] sm:$0xff]   ;;  %v3286_v22 = vld [vmem:[%s4151_s4 + $0x20] sm:$0xff]   ;;  %v3285_v23 = vld [vmem:[%s4151_s4 + $0x68] sm:$0xff]  }
  0x22   : > { %v3287_v24 = vld [vmem:[%s4151_s4 + $0x28] sm:$0xff]   ;;  %v3288_v25 = vld [vmem:[%s4151_s4 + $0x70] sm:$0xff]   ;;  %v3290_v27 = vld [vmem:[%s4151_s4 + $0x78] sm:$0xff]  }
  0x23   : > { %v3289_v26 = vld [vmem:[%s4151_s4 + $0x30] sm:$0xff]   ;;  %v3291_v28 = vld [vmem:[%s4151_s4 + $0x38] sm:$0xff]  }
  0x24   : > { %2854 = vmatmul.mubr.msk.bf16.gmra.mrb[8].mxu0 %vm351_vm1, %v339_v31 }
  0x25   : > { %2868 = vmatmul.mubr.msk.bf16.vlgmr.msra.gmra.mrb[8].mxu1 %vm351_vm1, %v320_v33  ;;  %2889 = vmatprep.mubr.msk.bf16.mxu0 %vm3358_vm0, %v3357_v1 }
  0x26   : > { %2910 = vmatpush3.bf16.msra.mxu1 %v3274_v32  ;;  %2871 = vmatprep.mubr.msk.bf16.mxu1 %vm3358_vm0, %v3357_v1 }
  0x27   : > { %2967 = vmatprep.subr.bf16.mxu1 %v3357_v1 }
  0x2c   : > { %2890 = vmatmul.mubr.msk.bf16.vlgmr.msra.gmra.mrb[12].mxu0 %vm351_vm1, %v544_v38 }
  0x2d   : > { %2872 = vmatmul.mubr.msk.bf16.gmra.mrb[12].mxu1 %vm351_vm1, %v321_v39  ;;  %2893 = vmatprep.mubr.msk.bf16.mxu0 %vm3358_vm0, %v3357_v1 }
  0x2e   : > { %2875 = vmatprep.mubr.msk.bf16.mxu1 %vm3358_vm0, %v3357_v1  ;;  %2932 = vmatpush3.bf16.msra.mxu0 %v3276_v13 }
  0x2f   : > { %2933 = vmatprep.subr.bf16.mxu0 %v3357_v1 }
  0x32   : > { %2934 = vmatpush3.bf16.msra.mxu0 %v3277_v14 }
  0x33   : > { %2935 = vmatprep.subr.bf16.mxu0 %v3357_v1 }
  0x34   : > { %2894 = vmatmul.mubr.msk.bf16.gmra.mrb[16].mxu0 %vm351_vm1, %v545_v44 }
  0x35   : > { %2876 = vmatmul.mubr.msk.bf16.gmra.mrb[16].mxu1 %vm351_vm1, %v322_v45  ;;  %2897 = vmatprep.mubr.msk.bf16.mxu0 %vm3358_vm0, %v3357_v1 }
  0x36   : > { %2879 = vmatprep.mubr.msk.bf16.mxu1 %vm3358_vm0, %v3357_v1  ;;  %2936 = vmatpush3.bf16.msra.mxu0 %v3279_v16 }
  0x37   : > { %2937 = vmatprep.subr.bf16.mxu0 %v3357_v1 }
  0x3a   : > { %2938 = vmatpush3.bf16.msra.mxu0 %v3281_v19 }
  0x3b   : > { %2939 = vmatprep.subr.bf16.mxu0 %v3357_v1 }
  0x3c   : > { %2898 = vmatmul.mubr.msk.bf16.gmra.mrb[20].mxu0 %vm351_vm1, %v546_v50 }
  0x3d   : > { %2880 = vmatmul.mubr.msk.bf16.gmra.mrb[20].mxu1 %vm351_vm1, %v323_v51  ;;  %2901 = vmatprep.mubr.msk.bf16.mxu0 %vm3358_vm0, %v3357_v1 }
  0x3e   : > { %2883 = vmatprep.mubr.msk.bf16.mxu1 %vm3358_vm0, %v3357_v1  ;;  %2940 = vmatpush3.bf16.msra.mxu0 %v3283_v20 }
  0x3f   : > { %2941 = vmatprep.subr.bf16.mxu0 %v3357_v1 }
  0x42   : > { %2942 = vmatpush3.bf16.msra.mxu0 %v3285_v23 }
  0x43   : > { %2943 = vmatprep.subr.bf16.mxu0 %v3357_v1 }
  0x44   : > { %2902 = vmatmul.mubr.msk.bf16.gmra.mrb[24].mxu0 %vm351_vm1, %v547_v56 }
  0x45   : > { %2884 = vmatmul.mubr.msk.bf16.gmra.mrb[24].mxu1 %vm351_vm1, %v324_v57  ;;  %2905 = vmatprep.mubr.msk.bf16.mxu0 %vm3358_vm0, %v3357_v1 }
  0x46   : > { %2911 = vmatprep.mubr.msk.bf16.mxu1 %vm3358_vm0, %v3357_v1  ;;  %2944 = vmatpush3.bf16.msra.mxu0 %v3288_v25 }
  0x47   : > { %2945 = vmatprep.subr.bf16.mxu0 %v3357_v1 }
  0x4a   : > { %2946 = vmatpush3.bf16.msra.mxu0 %v3290_v27 }
  0x4b   : > { %3003 = vmatprep.subr.bf16.mxu0 %v3357_v1 }
  0x4c   : > { %2906 = vmatmul.mubr.msk.bf16.gmra.mrb[28].mxu0 %vm351_vm1, %v548_v62 }
  0x4d   : > { %2912 = vmatmul.mubr.msk.bf16.vlgmr.msra.gmra.mrb[28].mxu1 %vm351_vm1, %v666_v63  ;;  %2947 = vmatprep.mubr.msk.bf16.mxu0 %vm3358_vm0, %v3357_v1 }
  0x4e   : > { %2915 = vmatprep.mubr.msk.bf16.mxu1 %vm3358_vm0, %v3357_v1  ;;  %2968 = vmatpush3.bf16.msra.mxu1 %v3278_v15 }
  0x4f   : > { %2969 = vmatprep.subr.bf16.mxu1 %v3357_v1 }
  0x52   : > { %2970 = vmatpush3.bf16.msra.mxu1 %v3280_v17 }
  0x53   : > { %2971 = vmatprep.subr.bf16.mxu1 %v3357_v1 }
  0x55   : > { %2916 = vmatmul.mubr.msk.bf16.gmra.mrb[32].mxu1 %vm351_vm1, %v667_v3 }
  0x56   : > { %2919 = vmatprep.mubr.msk.bf16.mxu1 %vm3358_vm0, %v3357_v1  ;;  %2972 = vmatpush3.bf16.msra.mxu1 %v3282_v18 }
  0x57   : > { %2973 = vmatprep.subr.bf16.mxu1 %v3357_v1 }
  0x5a   : > { %2974 = vmatpush3.bf16.msra.mxu1 %v3284_v21 }
  0x5b   : > { %2975 = vmatprep.subr.bf16.mxu1 %v3357_v1 }
  0x5d   : > { %2920 = vmatmul.mubr.msk.bf16.gmra.mrb[36].mxu1 %vm351_vm1, %v668_v6 }
  0x5e   : > { %2923 = vmatprep.mubr.msk.bf16.mxu1 %vm3358_vm0, %v3357_v1  ;;  %2976 = vmatpush3.bf16.msra.mxu1 %v3286_v22 }
  0x5f   : > { %2977 = vmatprep.subr.bf16.mxu1 %v3357_v1 }
  0x62   : > { %2978 = vmatpush3.bf16.msra.mxu1 %v3287_v24 }
  0x63   : > { %2979 = vmatprep.subr.bf16.mxu1 %v3357_v1 }
  0x65   : > { %2924 = vmatmul.mubr.msk.bf16.gmra.mrb[40].mxu1 %vm351_vm1, %v669_v9 }
  0x66   : > { %2927 = vmatprep.mubr.msk.bf16.mxu1 %vm3358_vm0, %v3357_v1  ;;  %2980 = vmatpush3.bf16.msra.mxu1 %v3289_v26 }
  0x67   : > { %2981 = vmatprep.subr.bf16.mxu1 %v3357_v1 }
  0x6a   : > { %2982 = vmatpush3.bf16.msra.mxu1 %v3291_v28 }
  0x6b   : > { %3039 = vmatprep.subr.bf16.mxu1 %v3357_v1 }
  0x6d   : > { %2928 = vmatmul.mubr.msk.bf16.gmra.mrb[44].mxu1 %vm351_vm1, %v670_v12 }
  0x6e   : > { %2983 = vmatprep.mubr.msk.bf16.mxu1 %vm3358_vm0, %v3357_v1 }
  0xe7   : > { %v401_v29 = vpop.f32.mrb[0].mxu0 }
  0xe8   : > { %v425_v30 = vpop.f32.mrb[0].mxu1  ;;  %v2847_v31 = vpop.f32.mrb[1].mxu0 }
  0xe9   : > { %v2859_v32 = vpop.f32.mrb[1].mxu1  ;;  %v404_v33 = vpop.f32.mrb[2].mxu0 }
  0xea   : > { %v428_v34 = vpop.f32.mrb[2].mxu1  ;;  %v2848_v35 = vpop.f32.mrb[3].mxu0 }
  0xeb   : > { %v2860_v36 = vpop.f32.mrb[3].mxu1 }
  0xef   : > { %v409_v37 = vpop.f32.mrb[4].mxu0 }
  0xf0   : > { %v433_v38 = vpop.f32.mrb[4].mxu1  ;;  %v2851_v39 = vpop.f32.mrb[5].mxu0 }
  0xf1   : > { %v2863_v40 = vpop.f32.mrb[5].mxu1  ;;  %v412_v41 = vpop.f32.mrb[6].mxu0 }
  0xf2   : > { %v436_v42 = vpop.f32.mrb[6].mxu1  ;;  %v2852_v43 = vpop.f32.mrb[7].mxu0 }
  0xf3   : > { %v2864_v44 = vpop.f32.mrb[7].mxu1  ;;  %v818_v43 = vpop.permute.xlu0 %817 }
  0xf7   : > { %v417_v45 = vpop.f32.mrb[8].mxu0 }
  0xf8   : > { %v495_v46 = vpop.f32.mrb[8].mxu1  ;;  %v2855_v47 = vpop.f32.mrb[9].mxu0 }
  0xf9   : > { %v496_v48 = vadd.f32 %v495_v46, %v401_v29  ;;  %v2869_v49 = vpop.f32.mrb[9].mxu1  ;;  %v420_v50 = vpop.f32.mrb[10].mxu0  ;;  %v3650_v46 = vld [vmem:[%s4149_s2] ss:$0 sm:$0xff] }
  0xfa   : > { %v498_v51 = vpop.f32.mrb[10].mxu1  ;;  %v2856_v52 = vpop.f32.mrb[11].mxu0 }
  0xfb   : > { %v499_v53 = vadd.f32 %v498_v51, %v404_v33  ;;  %v2870_v54 = vpop.f32.mrb[11].mxu1 }
  0xff   : > { %v607_v55 = vpop.f32.mrb[12].mxu0 }
 0x100   : > { %v503_v56 = vpop.f32.mrb[12].mxu1  ;;  %v646_v57 = vadd.f32 %v607_v55, %v496_v48  ;;  %v2891_v58 = vpop.f32.mrb[13].mxu0 }
 0x101   : > { %v504_v59 = vadd.f32 %v503_v56, %v409_v37  ;;  %v2873_v60 = vpop.f32.mrb[13].mxu1  ;;  %v610_v61 = vpop.f32.mrb[14].mxu0 }
 0x102   : > { %v506_v62 = vpop.f32.mrb[14].mxu1  ;;  %v647_v63 = vadd.f32 %v610_v61, %v499_v53  ;;  %v2892_v0 = vpop.f32.mrb[15].mxu0 }
 0x103   : > { %v507_v2 = vadd.f32 %v506_v62, %v412_v41  ;;  %v2874_v3 = vpop.f32.mrb[15].mxu1  ;;  %v823_v60 = vpop.permute.xlu0 %822 }
 0x107   : > { %v615_v4 = vpop.f32.mrb[16].mxu0 }
 0x108   : > { %v511_v5 = vpop.f32.mrb[16].mxu1  ;;  %v648_v6 = vadd.f32 %v615_v4, %v504_v59  ;;  %v2895_v7 = vpop.f32.mrb[17].mxu0 }
 0x109   : > { %v512_v8 = vadd.f32 %v511_v5, %v417_v45  ;;  %v2877_v9 = vpop.f32.mrb[17].mxu1  ;;  %v618_v10 = vpop.f32.mrb[18].mxu0 }
 0x10a   : > { %v514_v11 = vpop.f32.mrb[18].mxu1  ;;  %v649_v12 = vadd.f32 %v618_v10, %v507_v2  ;;  %v2896_v13 = vpop.f32.mrb[19].mxu0  ;;  %v930_v10 = vld [vmem:[#allocation2 + $0x6] sm:$0xff] }
 0x10b   : > { %v515_v14 = vadd.f32 %v514_v11, %v420_v50  ;;  %v2878_v15 = vpop.f32.mrb[19].mxu1  ;;  %v828_v2 = vpop.permute.xlu1 %827  ;;  %v899_v11 = vld [vmem:[#allocation2 + $0x5] sm:$0xff] }
 0x10f   : > { %v623_v16 = vpop.f32.mrb[20].mxu0 }
 0x110   : > { %v519_v17 = vpop.f32.mrb[20].mxu1  ;;  %v3637_v18 = vadd.f32 %v623_v16, %v512_v8  ;;  %v2899_v19 = vpop.f32.mrb[21].mxu0 }
 0x111   : > { %v520_v20 = vadd.f32 %v519_v17, %v425_v30  ;;  %v2881_v21 = vpop.f32.mrb[21].mxu1  ;;  %v626_v22 = vpop.f32.mrb[22].mxu0 }
 0x112   : > { %v522_v23 = vpop.f32.mrb[22].mxu1  ;;  %v3639_v24 = vadd.f32 %v626_v22, %v515_v14  ;;  %v2900_v25 = vpop.f32.mrb[23].mxu0 }
 0x113   : > { %v523_v26 = vadd.f32 %v522_v23, %v428_v34  ;;  %v2882_v27 = vpop.f32.mrb[23].mxu1  ;;  %v833_v14 = vpop.permute.xlu1 %832 }
 0x117   : > { %v631_v28 = vpop.f32.mrb[24].mxu0 }
 0x118   : > { %v527_v29 = vpop.f32.mrb[24].mxu1  ;;  %v3641_v31 = vadd.f32 %v631_v28, %v520_v20  ;;  %v2903_v32 = vpop.f32.mrb[25].mxu0 }
 0x119   : > { %v528_v33 = vadd.f32 %v527_v29, %v433_v38  ;;  %v2885_v35 = vpop.f32.mrb[25].mxu1  ;;  %v634_v36 = vpop.f32.mrb[26].mxu0 }
 0x11a   : > { %v530_v37 = vpop.f32.mrb[26].mxu1  ;;  %v3643_v39 = vadd.f32 %v634_v36, %v523_v26  ;;  %v2904_v30 = vpop.f32.mrb[27].mxu0  ;;  %v3294_v26 = vld [vmem:[%s4151_s4 + $0xc0] sm:$0xff]   ;;  %v3296_v36 = vld [vmem:[%s4151_s4 + $0xc8] sm:$0xff]  }
 0x11b   : > { %v531_v40 = vadd.f32 %v530_v37, %v436_v42  ;;  %v2886_v41 = vpop.f32.mrb[27].mxu1 }
 0x11c   : > { %v3295_v41 = vld [vmem:[%s4151_s4 + $0x90] sm:$0xff]  }
 0x11f   : > { %v639_v44 = vpop.f32.mrb[28].mxu0 }
 0x120   : > { %v3645_v45 = vadd.f32 %v639_v44, %v528_v33  ;;  %v729_v34 = vpop.f32.mrb[28].mxu1  ;;  %v2907_v47 = vpop.f32.mrb[29].mxu0 }
 0x121   : > { %v768_v38 = vadd.f32 %v729_v34, %v646_v57  ;;  %v2913_v48 = vpop.f32.mrb[29].mxu1  ;;  %v642_v49 = vpop.f32.mrb[30].mxu0 }
 0x122   : > { %v3652_v50 = vadd.f32 %v642_v49, %v531_v40  ;;  %v732_v51 = vpop.f32.mrb[30].mxu1  ;;  %v2908_v52 = vpop.f32.mrb[31].mxu0 }
 0x123   : > { %v785_v42 = vadd.f32 %v3650_v46, %v768_v38  ;;  %v769_v53 = vadd.f32 %v732_v51, %v647_v63  ;;  %v2914_v54 = vpop.f32.mrb[31].mxu1 }
 0x125   : > { %v795_v55 = vmax.f32 %v785_v42, 0.0  ;;  %v786_v56 = vadd.f32 %v3650_v46, %v769_v53 }
 0x127   : > { %v3656_v58 = vmul.f32 %v818_v43, %v795_v55  ;;  %v796_v59 = vmax.f32 %v786_v56, 0.0  ;;  %v843_v43 = vpop.permute.xlu1 %842 }
 0x128   : > { %v737_v61 = vpop.f32.mrb[32].mxu1 }
 0x129   : > { %889 = vst [vmem:[#allocation2 + $0x10] sm:$0xff] %v3656_v58  ;;  %v3659_v57 = vmul.f32 %v823_v60, %v796_v59  ;;  %v770_v62 = vadd.f32 %v737_v61, %v648_v6  ;;  %v2917_v0 = vpop.f32.mrb[33].mxu1  ;;  %v3712_v59 = vld [vmem:[#allocation2] sm:$0xff] }
 0x12a   : > { %v740_v3 = vpop.f32.mrb[34].mxu1 }
 0x12b   : > { %890 = vst [vmem:[#allocation2 + $0x18] sm:$0xff] %v3659_v57  ;;  %v787_v63 = vadd.f32 %v3650_v46, %v770_v62  ;;  %v771_v4 = vadd.f32 %v740_v3, %v649_v12  ;;  %v2918_v5 = vpop.f32.mrb[35].mxu1  ;;  %v1540_v7 = vpack.c.bf16 %v3659_v57, %v3656_v58  ;;  %v3292_v12 = vld [vmem:[%s4151_s4 + $0x80] sm:$0xff]   ;;  %v3328_v58 = vld [vmem:[%s4151_s4 + $0x1c8] sm:$0xff]  }
 0x12c   : > { %v853_v5 = vpop.permute.xlu1 %852 }
 0x12d   : > { %v797_v8 = vmax.f32 %v787_v63, 0.0  ;;  %v788_v9 = vadd.f32 %v3650_v46, %v771_v4  ;;  %v3299_v63 = vld [vmem:[%s4151_s4 + $0xa0] sm:$0xff]   ;;  %v3300_v4 = vld [vmem:[%s4151_s4 + $0xd8] sm:$0xff]  }
 0x12f   : > { %v3666_v13 = vmul.f32 %v828_v2, %v797_v8  ;;  %v798_v6 = vmax.f32 %v788_v9, 0.0 }
 0x130   : > { %v745_v15 = vpop.f32.mrb[36].mxu1  ;;  %v931_v16 = vld [vmem:[#allocation2 + $0xe] sm:$0xff] }
 0x131   : > { %v900_v17 = vld [vmem:[#allocation2 + $0xd] sm:$0xff]  ;;  %891 = vst [vmem:[#allocation2 + $0x20] sm:$0xff] %v3666_v13  ;;  %v3672_v19 = vmul.f32 %v833_v14, %v798_v6  ;;  %v772_v20 = vadd.f32 %v745_v15, %v3637_v18  ;;  %v2921_v21 = vpop.f32.mrb[37].mxu1  ;;  %v940_v22 = vpack.c.bf16 %v931_v16, %v930_v10 }
 0x132   : > { %v909_v23 = vpack.c.bf16 %v900_v17, %v899_v11  ;;  %v748_v25 = vpop.f32.mrb[38].mxu1  ;;  %v3293_v18 = vld [vmem:[%s4151_s4 + $0x88] sm:$0xff]   ;;  %v932_v40 = vld [vmem:[#allocation2 + $0x16] sm:$0xff] }
 0x133   : > { %892 = vst [vmem:[#allocation2 + $0x28] sm:$0xff] %v3672_v19  ;;  %v789_v27 = vadd.f32 %v3650_v46, %v772_v20  ;;  %v773_v28 = vadd.f32 %v748_v25, %v3639_v24  ;;  %v2922_v29 = vpop.f32.mrb[39].mxu1  ;;  %2948 = vmatmul.mubr.bf16.vlgmr.msra.gmra.mrb[32].mxu0 %v940_v22  ;;  %v1541_v32 = vpack.c.bf16 %v3672_v19, %v3666_v13  ;;  %v838_v24 = vpop.permute.xlu0 %837  ;;  %v901_v47 = vld [vmem:[#allocation2 + $0x15] sm:$0xff] }
 0x134   : > { %2984 = vmatmul.mubr.bf16.vlgmr.msra.gmra.mrb[48].mxu1 %v909_v23  ;;  %3004 = vmatpush3.bf16.msra.mxu0 %v3292_v12  ;;  %v3302_v23 = vld [vmem:[%s4151_s4 + $0xe0] sm:$0xff]  }
 0x135   : > { %2951 = vmatprep.mubr.msk.bf16.mxu0 %vm3358_vm0, %v3357_v1  ;;  %v799_v33 = vmax.f32 %v789_v27, 0.0  ;;  %v790_v35 = vadd.f32 %v3650_v46, %v773_v28  ;;  %3005 = vmatprep.subr.bf16.mxu0 %v3357_v1 }
 0x136   : > { %2987 = vmatprep.mubr.msk.bf16.mxu1 %vm3358_vm0, %v3357_v1  ;;  %3040 = vmatpush3.bf16.msra.mxu1 %v3294_v26 }
 0x137   : > { %v3695_v37 = vmul.f32 %v838_v24, %v799_v33  ;;  %v800_v30 = vmax.f32 %v790_v35, 0.0  ;;  %3041 = vmatprep.subr.bf16.mxu1 %v3357_v1  ;;  %v848_v62 = vpop.permute.xlu0 %847  ;;  %v3303_v33 = vld [vmem:[%s4151_s4 + $0xe8] sm:$0xff]   ;;  %v863_v35 = vpop.permute.xlu1 %862 }
 0x138   : > { %v753_v44 = vpop.f32.mrb[40].mxu1  ;;  %3006 = vmatpush3.bf16.msra.mxu0 %v3293_v18  ;;  %v933_v34 = vld [vmem:[#allocation2 + $0x1e] sm:$0xff] }
 0x139   : > { %v902_v38 = vld [vmem:[#allocation2 + $0x1d] sm:$0xff]  ;;  %893 = vst [vmem:[#allocation2 + $0x30] sm:$0xff] %v3695_v37  ;;  %v3702_v48 = vmul.f32 %v843_v43, %v800_v30  ;;  %v774_v49 = vadd.f32 %v753_v44, %v3641_v31  ;;  %v2925_v51 = vpop.f32.mrb[41].mxu1  ;;  %v941_v52 = vpack.c.bf16 %v933_v34, %v932_v40  ;;  %3007 = vmatprep.subr.bf16.mxu0 %v3357_v1  ;;  %v3298_v31 = vld [vmem:[%s4151_s4 + $0xd0] sm:$0xff]  }
 0x13a   : > { %v910_v42 = vpack.c.bf16 %v902_v38, %v901_v47  ;;  %v756_v53 = vpop.f32.mrb[42].mxu1  ;;  %3042 = vmatpush3.bf16.msra.mxu1 %v3296_v36  ;;  %v3297_v1 = vld [vmem:[%s4151_s4 + $0x98] sm:$0xff]   ;;  %v934_v3 = vld [vmem:[#allocation2 + $0x26] sm:$0xff]  ;;  %v3305_v34 = vld [vmem:[%s4151_s4 + $0xf0] sm:$0xff]  }
 0x13b   : > { %894 = vst [vmem:[#allocation2 + $0x38] sm:$0xff] %v3702_v48  ;;  %v791_v54 = vadd.f32 %v3650_v46, %v774_v49  ;;  %v775_v55 = vadd.f32 %v756_v53, %v3643_v39  ;;  %v2926_v56 = vpop.f32.mrb[43].mxu1  ;;  %2952 = vmatmul.mubr.bf16.gmra.mrb[36].mxu0 %v941_v52  ;;  %v1542_v39 = vpack.c.bf16 %v3702_v48, %v3695_v37  ;;  %v903_v10 = vld [vmem:[#allocation2 + $0x25] sm:$0xff]  ;;  %v3306_v47 = vld [vmem:[%s4151_s4 + $0xb8] sm:$0xff]  }
 0x13c   : > { %2988 = vmatmul.mubr.bf16.gmra.mrb[52].mxu1 %v910_v42  ;;  %3008 = vmatpush3.bf16.msra.mxu0 %v3295_v41  ;;  %v3307_v49 = vld [vmem:[%s4151_s4 + $0xf8] sm:$0xff]   ;;  %v1205_v56 = vld [vmem:[#allocation2 + $0xf] sm:$0xff]  ;;  %v3906_v57 = vld [vmem:[#allocation2 + $0x21] sm:$0xff] }
 0x13d   : > { %2955 = vmatprep.mubr.msk.bf16.mxu0 %vm3358_vm0, %v3712_v59  ;;  %v801_v60 = vmax.f32 %v791_v54, 0.0  ;;  %v792_v61 = vadd.f32 %v3650_v46, %v775_v55  ;;  %3009 = vmatprep.subr.bf16.mxu0 %v3712_v59  ;;  %v1204_v55 = vld [vmem:[#allocation2 + $0x7] sm:$0xff] }
 0x13e   : > { %2991 = vmatprep.mubr.msk.bf16.mxu1 %vm3358_vm0, %v3712_v59  ;;  %3043 = vmatprep.subr.bf16.mxu1 %v3712_v59  ;;  %v3335_v48 = vld [vmem:[%s4151_s4 + $0x1e8] sm:$0xff]  }
 0x13f   : > { %v3726_v0 = vmul.f32 %v848_v62, %v801_v60  ;;  %v802_v2 = vmax.f32 %v792_v61, 0.0  ;;  %3044 = vmatpush3.bf16.msra.mxu1 %v3298_v31  ;;  %v1368_v31 = vld [vmem:[#allocation2 + $0x17] sm:$0xff]  ;;  %v1214_v60 = vpack.c.bf16 %v1205_v56, %v1204_v55  ;;  %v3310_v62 = vld [vmem:[%s4151_s4 + $0x140] sm:$0xff]  }
 0x140   : > { %v761_v8 = vpop.f32.mrb[44].mxu1  ;;  %3010 = vmatpush3.bf16.msra.mxu0 %v3297_v1  ;;  %v935_v9 = vld [vmem:[#allocation2 + $0x2e] sm:$0xff]  ;;  %3045 = vmatprep.subr.bf16.mxu1 %v3712_v59  ;;  %v3308_v1 = vld [vmem:[%s4151_s4 + $0x100] sm:$0xff]   ;;  %v1377_v61 = vpack.c.bf16 %v1368_v31, %v1205_v56 }
 0x141   : > { %v904_v11 = vld [vmem:[#allocation2 + $0x2d] sm:$0xff]  ;;  %895 = vst [vmem:[#allocation2 + $0x40] sm:$0xff] %v3726_v0  ;;  %v3736_v6 = vmul.f32 %v853_v5, %v802_v2  ;;  %v776_v14 = vadd.f32 %v761_v8, %v3645_v45  ;;  %v2929_v15 = vpop.f32.mrb[45].mxu1  ;;  %v942_v16 = vpack.c.bf16 %v935_v9, %v934_v3  ;;  %3011 = vmatprep.subr.bf16.mxu0 %v3712_v59  ;;  %v1207_v3 = vld [vmem:[#allocation2 + $0x1f] sm:$0xff] }
 0x142   : > { %v911_v17 = vpack.c.bf16 %v904_v11, %v903_v10  ;;  %v764_v12 = vpop.f32.mrb[46].mxu1  ;;  %v3301_v45 = vld [vmem:[%s4151_s4 + $0xa8] sm:$0xff]   ;;  %v936_v18 = vld [vmem:[#allocation2 + $0x36] sm:$0xff]  ;;  %v1215_v8 = vpack.c.bf16 %v1207_v3, %v1368_v31  ;;  %v3334_v31 = vld [vmem:[%s4151_s4 + $0x1e0] sm:$0xff]  }
 0x143   : > { %896 = vst [vmem:[#allocation2 + $0x48] sm:$0xff] %v3736_v6  ;;  %v793_v20 = vadd.f32 %v3650_v46, %v776_v14  ;;  %v777_v21 = vadd.f32 %v764_v12, %v3652_v50  ;;  %v2930_v22 = vpop.f32.mrb[47].mxu1  ;;  %2956 = vmatmul.mubr.bf16.gmra.mrb[40].mxu0 %v942_v16  ;;  %3046 = vmatpush3.bf16.msra.mxu1 %v3300_v4  ;;  %v858_v50 = vpop.permute.xlu0 %857  ;;  %v905_v36 = vld [vmem:[#allocation2 + $0x35] sm:$0xff]  ;;  %v3309_v2 = vld [vmem:[%s4151_s4 + $0x108] sm:$0xff]   ;;  %v3315_v16 = vld [vmem:[%s4151_s4 + $0x120] sm:$0xff]  }
 0x144   : > { %2992 = vmatmul.mubr.bf16.gmra.mrb[56].mxu1 %v911_v17  ;;  %3012 = vmatpush3.bf16.msra.mxu0 %v3299_v63  ;;  %v1543_v25 = vpack.c.bf16 %v3736_v6, %v3726_v0  ;;  %v1370_v63 = vld [vmem:[#allocation2 + $0x27] sm:$0xff]  ;;  %v3311_v5 = vld [vmem:[%s4151_s4 + $0x110] sm:$0xff]   ;;  %v3313_v11 = vld [vmem:[%s4151_s4 + $0x118] sm:$0xff]  }
 0x145   : > { %v803_v26 = vmax.f32 %v793_v20, 0.0  ;;  %v794_v27 = vadd.f32 %v3650_v46, %v777_v21  ;;  %2959 = vmatprep.mubr.msk.bf16.mxu0 %vm3358_vm0, %v3712_v59  ;;  %2995 = vmatprep.mubr.msk.bf16.mxu1 %vm3358_vm0, %v3712_v59  ;;  %v3304_v46 = vld [vmem:[%s4151_s4 + $0xb0] sm:$0xff]   ;;  %v3312_v4 = vld [vmem:[%s4151_s4 + $0x148] sm:$0xff]   ;;  %v1378_v9 = vpack.c.bf16 %v1370_v63, %v1207_v3  ;;  %v3316_v17 = vld [vmem:[%s4151_s4 + $0x158] sm:$0xff]  }
 0x146   : > { %3013 = vmatprep.subr.bf16.mxu0 %v3712_v59  ;;  %3047 = vmatprep.subr.bf16.mxu1 %v3712_v59  ;;  %v3314_v10 = vld [vmem:[%s4151_s4 + $0x150] sm:$0xff]   ;;  %v3317_v21 = vld [vmem:[%s4151_s4 + $0x128] sm:$0xff]   ;;  %v3318_v22 = vld [vmem:[%s4151_s4 + $0x160] sm:$0xff]  }
 0x147   : > { %v3758_v28 = vmul.f32 %v858_v50, %v803_v26  ;;  %v804_v29 = vmax.f32 %v794_v27, 0.0  ;;  %3048 = vmatpush3.bf16.msra.mxu1 %v3302_v23  ;;  %v1209_v14 = vld [vmem:[#allocation2 + $0x2f] sm:$0xff]  ;;  %v1372_v15 = vld [vmem:[#allocation2 + $0x37] sm:$0xff]  ;;  %v2020_v3 = vld [vmem:[#allocation2 + $0x22] sm:$0xff] }
 0x148   : > { %v937_v24 = vld [vmem:[#allocation2 + $0x3e] sm:$0xff]  ;;  %3014 = vmatpush3.bf16.msra.mxu0 %v3301_v45  ;;  %3049 = vmatprep.subr.bf16.mxu1 %v3712_v59  ;;  %v1216_v12 = vpack.c.bf16 %v1209_v14, %v1370_v63  ;;  %v1379_v20 = vpack.c.bf16 %v1372_v15, %v1209_v14  ;;  %v3319_v26 = vld [vmem:[%s4151_s4 + $0x168] sm:$0xff]   ;;  %v3320_v27 = vld [vmem:[%s4151_s4 + $0x130] sm:$0xff]  }
 0x149   : > { %v906_v30 = vld [vmem:[#allocation2 + $0x3d] sm:$0xff]  ;;  %897 = vst [vmem:[#allocation2 + $0x50] sm:$0xff] %v3758_v28  ;;  %v3767_v40 = vmul.f32 %v863_v35, %v804_v29  ;;  %v943_v41 = vpack.c.bf16 %v937_v24, %v936_v18  ;;  %3015 = vmatprep.subr.bf16.mxu0 %v3712_v59  ;;  %v3321_v18 = vld [vmem:[%s4151_s4 + $0x170] sm:$0xff]   ;;  %v3333_v56 = vld [vmem:[%s4151_s4 + $0x1a8] sm:$0xff]  }
 0x14a   : > { %v912_v43 = vpack.c.bf16 %v906_v30, %v905_v36  ;;  %v938_v38 = vld [vmem:[#allocation2 + $0x46] sm:$0xff]  ;;  %v3323_v24 = vld [vmem:[%s4151_s4 + $0x178] sm:$0xff]  }
 0x14b   : > { %898 = vst [vmem:[#allocation2 + $0x58] sm:$0xff] %v3767_v40  ;;  %2960 = vmatmul.mubr.bf16.gmra.mrb[44].mxu0 %v943_v41  ;;  %v1544_v44 = vpack.c.bf16 %v3767_v40, %v3758_v28  ;;  %3050 = vmatpush3.bf16.msra.mxu1 %v3303_v33  ;;  %v907_v52 = vld [vmem:[#allocation2 + $0x45] sm:$0xff]  ;;  %v3322_v33 = vld [vmem:[%s4151_s4 + $0x138] sm:$0xff]  }
 0x14c   : > { %2996 = vmatmul.mubr.bf16.gmra.mrb[60].mxu1 %v912_v43  ;;  %3016 = vmatpush3.bf16.msra.mxu0 %v3304_v46  ;;  %v1211_v45 = vld [vmem:[#allocation2 + $0x3f] sm:$0xff]  ;;  %v1374_v23 = vld [vmem:[#allocation2 + $0x47] sm:$0xff]  ;;  %v1693_v43 = vld [vmem:[#allocation2 + $0x11] sm:$0xff] }
 0x14d   : > { %2963 = vmatprep.mubr.msk.bf16.mxu0 %vm3358_vm0, %v3712_v59  ;;  %2999 = vmatprep.mubr.msk.bf16.mxu1 %vm3358_vm0, %v3712_v59  ;;  %v1217_v50 = vpack.c.bf16 %v1211_v45, %v1372_v15  ;;  %v1380_v29 = vpack.c.bf16 %v1374_v23, %v1211_v45  ;;  %v3880_v41 = vld [vmem:[#allocation2 + $0x19] sm:$0xff]  ;;  %v3931_v19 = vld [vmem:[#allocation2 + $0x31] sm:$0xff]  ;;  %v3960_v37 = vld [vmem:[#allocation2 + $0x41] sm:$0xff] }
 0x14e   : > { %3051 = vmatprep.subr.bf16.mxu1 %v3712_v59  ;;  %3017 = vmatprep.subr.bf16.mxu0 %v3712_v59  ;;  %v3928_v13 = vld [vmem:[#allocation2 + $0x39] sm:$0xff]  ;;  %v3341_v28 = vld [vmem:[%s4151_s4 + $0x208] sm:$0xff]  }
 0x14f   : > { %3052 = vmatpush3.bf16.msra.mxu1 %v3305_v34  ;;  %v3324_v34 = vld [vmem:[%s4151_s4 + $0x180] sm:$0xff]   ;;  %v1705_v55 = vpack.c.bf16 %v3928_v13, %v3931_v19  ;;  %v3339_v6 = vld [vmem:[%s4151_s4 + $0x1f8] sm:$0xff]  }
 0x150   : > { %v939_v51 = vld [vmem:[#allocation2 + $0x4e] sm:$0xff]  ;;  %3018 = vmatpush3.bf16.msra.mxu0 %v3306_v47  ;;  %3053 = vmatprep.subr.bf16.mxu1 %v3712_v59  ;;  %v1703_v47 = vpack.c.bf16 %v3880_v41, %v1693_v43  ;;  %v2019_v63 = vld [vmem:[#allocation2 + $0x1a] sm:$0xff]  ;;  %v2024_v15 = vld [vmem:[#allocation2 + $0x42] sm:$0xff] }
 0x151   : > { %v908_v42 = vld [vmem:[#allocation2 + $0x4d] sm:$0xff]  ;;  %v944_v53 = vpack.c.bf16 %v939_v51, %v938_v38  ;;  %3075 = vmatprep.subr.bf16.mxu0 %v3712_v59  ;;  %v3326_v38 = vld [vmem:[%s4151_s4 + $0x1c0] sm:$0xff]   ;;  %v3343_v14 = vld [vmem:[%s4151_s4 + $0x218] sm:$0xff]  }
 0x152   : > { %v913_v54 = vpack.c.bf16 %v908_v42, %v907_v52  ;;  %v1213_v46 = vld [vmem:[#allocation2 + $0x4f] sm:$0xff]  ;;  %v1376_v35 = vld [vmem:[#allocation2 + $0x57] sm:$0xff] }
 0x153   : > { %2964 = vmatmul.mubr.bf16.gmra.mrb[48].mxu0 %v944_v53  ;;  %3054 = vmatpush3.bf16.msra.mxu1 %v3307_v49  ;;  %v1218_v36 = vpack.c.bf16 %v1213_v46, %v1374_v23  ;;  %v1381_v30 = vpack.c.bf16 %v1376_v35, %v1213_v46  ;;  %v3325_v49 = vld [vmem:[%s4151_s4 + $0x188] sm:$0xff]   ;;  %v3330_v42 = vld [vmem:[%s4151_s4 + $0x1d0] sm:$0xff]   ;;  %v3329_v53 = vld [vmem:[%s4151_s4 + $0x198] sm:$0xff]  }
 0x154   : > { %3000 = vmatmul.mubr.bf16.gmra.mrb[64].mxu1 %v913_v54  ;;  %3019 = vmatprep.mubr.msk.bf16.mxu0 %vm3358_vm0, %v3712_v59  ;;  %v3900_v51 = vld [vmem:[#allocation2 + $0x29] sm:$0xff]  ;;  %v3332_v54 = vld [vmem:[%s4151_s4 + $0x1d8] sm:$0xff]  }
 0x155   : > { %3055 = vmatprep.mubr.msk.bf16.mxu1 %vm3358_vm0, %v3712_v59  ;;  %3111 = vmatprep.subr.bf16.mxu1 %v3712_v59  ;;  %v1704_v52 = vpack.c.bf16 %v3900_v51, %v3906_v57  ;;  %v3985_v0 = vld [vmem:[#allocation2 + $0x59] sm:$0xff]  ;;  %v2025_v45 = vld [vmem:[#allocation2 + $0x4a] sm:$0xff] }
 0x156   : > { %v2022_v40 = vld [vmem:[#allocation2 + $0x32] sm:$0xff] }
 0x157   : > { %v3346_v23 = vld [vmem:[%s4151_s4 + $0x230] sm:$0xff]  }
 0x158   : > { %v2184_v43 = vld [vmem:[#allocation2 + $0x2b] sm:$0xff] }
 0x15b   : > { %3020 = vmatmul.mubr.bf16.vlgmr.msra.gmra.mrb[52].mxu0 %v1214_v60 }
 0x15c   : > { %3056 = vmatmul.mubr.bf16.vlgmr.msra.gmra.mrb[68].mxu1 %v1377_v61  ;;  %3076 = vmatpush3.bf16.msra.mxu0 %v3308_v1  ;;  %v3956_v1 = vld [vmem:[#allocation2 + $0x49] sm:$0xff] }
 0x15d   : > { %3023 = vmatprep.mubr.msk.bf16.mxu0 %vm3358_vm0, %v3712_v59  ;;  %3077 = vmatprep.subr.bf16.mxu0 %v3712_v59  ;;  %v1706_v60 = vpack.c.bf16 %v3956_v1, %v3960_v37  ;;  %v3337_v61 = vld [vmem:[%s4151_s4 + $0x1f0] sm:$0xff]  }
 0x15e   : > { %3059 = vmatprep.mubr.msk.bf16.mxu1 %vm3358_vm0, %v3712_v59  ;;  %3112 = vmatpush3.bf16.msra.mxu1 %v3310_v62  ;;  %v3338_v62 = vld [vmem:[%s4151_s4 + $0x1b8] sm:$0xff]  }
 0x15f   : > { %3113 = vmatprep.subr.bf16.mxu1 %v3712_v59 }
 0x160   : > { %3078 = vmatpush3.bf16.msra.mxu0 %v3309_v2  ;;  %v1701_v2 = vld [vmem:[#allocation2 + $0x51] sm:$0xff] }
 0x161   : > { %3079 = vmatprep.subr.bf16.mxu0 %v3712_v59 }
 0x162   : > { %3114 = vmatpush3.bf16.msra.mxu1 %v3312_v4  ;;  %v3340_v4 = vld [vmem:[%s4151_s4 + $0x200] sm:$0xff]  }
 0x163   : > { %3024 = vmatmul.mubr.bf16.gmra.mrb[56].mxu0 %v1215_v8  ;;  %3115 = vmatprep.subr.bf16.mxu1 %v3712_v59  ;;  %v2029_v8 = vpack.c.bf16 %v2020_v3, %v2019_v63 }
 0x164   : > { %3060 = vmatmul.mubr.bf16.gmra.mrb[72].mxu1 %v1378_v9  ;;  %3080 = vmatpush3.bf16.msra.mxu0 %v3311_v5  ;;  %v1866_v5 = vpack.c.bf16 %v3906_v57, %v3880_v41  ;;  %v3342_v9 = vld [vmem:[%s4151_s4 + $0x210] sm:$0xff]  }
 0x165   : > { %3027 = vmatprep.mubr.msk.bf16.mxu0 %vm3358_vm0, %v3712_v59  ;;  %3081 = vmatprep.subr.bf16.mxu0 %v3712_v59  ;;  %v2185_v41 = vld [vmem:[#allocation2 + $0x33] sm:$0xff] }
 0x166   : > { %3063 = vmatprep.mubr.msk.bf16.mxu1 %vm3358_vm0, %v3712_v59  ;;  %3116 = vmatpush3.bf16.msra.mxu1 %v3314_v10  ;;  %v1867_v10 = vpack.c.bf16 %v3931_v19, %v3900_v51  ;;  %v2189_v51 = vld [vmem:[#allocation2 + $0x53] sm:$0xff] }
 0x167   : > { %3117 = vmatprep.subr.bf16.mxu1 %v3712_v59 }
 0x168   : > { %3082 = vmatpush3.bf16.msra.mxu0 %v3313_v11 }
 0x169   : > { %3083 = vmatprep.subr.bf16.mxu0 %v3712_v59 }
 0x16a   : > { %3118 = vmatpush3.bf16.msra.mxu1 %v3316_v17  ;;  %v3344_v17 = vld [vmem:[%s4151_s4 + $0x220] sm:$0xff]  }
 0x16b   : > { %3028 = vmatmul.mubr.bf16.gmra.mrb[60].mxu0 %v1216_v12  ;;  %3119 = vmatprep.subr.bf16.mxu1 %v3712_v59  ;;  %v1868_v12 = vpack.c.bf16 %v3960_v37, %v3928_v13 }
 0x16c   : > { %3064 = vmatmul.mubr.bf16.gmra.mrb[76].mxu1 %v1379_v20  ;;  %3084 = vmatpush3.bf16.msra.mxu0 %v3315_v16  ;;  %v2023_v16 = vld [vmem:[#allocation2 + $0x3a] sm:$0xff] }
 0x16d   : > { %3031 = vmatprep.mubr.msk.bf16.mxu0 %vm3358_vm0, %v3712_v59  ;;  %3067 = vmatprep.mubr.msk.bf16.mxu1 %vm3358_vm0, %v3712_v59  ;;  %v2031_v20 = vpack.c.bf16 %v2024_v15, %v2023_v16 }
 0x16e   : > { %3085 = vmatprep.subr.bf16.mxu0 %v3712_v59  ;;  %3120 = vmatpush3.bf16.msra.mxu1 %v3318_v22  ;;  %v2026_v22 = vld [vmem:[#allocation2 + $0x52] sm:$0xff] }
 0x16f   : > { %3121 = vmatprep.subr.bf16.mxu1 %v3712_v59 }
 0x170   : > { %3086 = vmatpush3.bf16.msra.mxu0 %v3317_v21  ;;  %v3345_v21 = vld [vmem:[%s4151_s4 + $0x228] sm:$0xff]  }
 0x171   : > { %3087 = vmatprep.subr.bf16.mxu0 %v3712_v59 }
 0x172   : > { %3122 = vmatpush3.bf16.msra.mxu1 %v3319_v26  ;;  %v1869_v26 = vpack.c.bf16 %v1701_v2, %v3956_v1 }
 0x173   : > { %3032 = vmatmul.mubr.bf16.gmra.mrb[64].mxu0 %v1217_v50  ;;  %3123 = vmatprep.subr.bf16.mxu1 %v3712_v59  ;;  %v3347_v50 = vld [vmem:[%s4151_s4 + $0x238] sm:$0xff]  }
 0x174   : > { %3068 = vmatmul.mubr.bf16.gmra.mrb[80].mxu1 %v1380_v29  ;;  %3088 = vmatpush3.bf16.msra.mxu0 %v3320_v27  ;;  %v2032_v27 = vpack.c.bf16 %v2026_v22, %v2025_v45  ;;  %v1865_v29 = vld [vmem:[#allocation2 + $0x61] sm:$0xff] }
 0x175   : > { %3035 = vmatprep.mubr.msk.bf16.mxu0 %vm3358_vm0, %v3712_v59  ;;  %3071 = vmatprep.mubr.msk.bf16.mxu1 %vm3358_vm0, %v3712_v59  ;;  %v1870_v46 = vpack.c.bf16 %v1865_v29, %v3985_v0 }
 0x176   : > { %3089 = vmatprep.subr.bf16.mxu0 %v3712_v59  ;;  %3124 = vmatpush3.bf16.msra.mxu1 %v3321_v18  ;;  %v2027_v18 = vld [vmem:[#allocation2 + $0x5a] sm:$0xff] }
 0x177   : > { %3125 = vmatprep.subr.bf16.mxu1 %v3712_v59 }
 0x178   : > { %3090 = vmatpush3.bf16.msra.mxu0 %v3322_v33  ;;  %v2028_v33 = vld [vmem:[#allocation2 + $0x62] sm:$0xff] }
 0x179   : > { %3147 = vmatprep.subr.bf16.mxu0 %v3712_v59  ;;  %v2033_v35 = vpack.c.bf16 %v2028_v33, %v2027_v18 }
 0x17a   : > { %3126 = vmatpush3.bf16.msra.mxu1 %v3323_v24  ;;  %v2183_v24 = vld [vmem:[#allocation2 + $0x23] sm:$0xff] }
 0x17b   : > { %3036 = vmatmul.mubr.bf16.gmra.mrb[68].mxu0 %v1218_v36  ;;  %3183 = vmatprep.subr.bf16.mxu1 %v3712_v59  ;;  %v2182_v36 = vld [vmem:[#allocation2 + $0x1b] sm:$0xff] }
 0x17c   : > { %3072 = vmatmul.mubr.bf16.gmra.mrb[84].mxu1 %v1381_v30  ;;  %3091 = vmatprep.mubr.msk.bf16.mxu0 %vm3358_vm0, %v3712_v59  ;;  %v2192_v30 = vpack.c.bf16 %v2183_v24, %v2182_v36 }
 0x17d   : > { %3127 = vmatprep.mubr.msk.bf16.mxu1 %vm3358_vm0, %v3712_v59 }
 0x183   : > { %3092 = vmatmul.mubr.bf16.vlgmr.msra.gmra.mrb[72].mxu0 %v1540_v7  ;;  %v3327_v7 = vld [vmem:[%s4151_s4 + $0x190] sm:$0xff]  }
 0x184   : > { %3128 = vmatmul.mubr.bf16.vlgmr.msra.gmra.mrb[88].mxu1 %v1703_v47  ;;  %3148 = vmatpush3.bf16.msra.mxu0 %v3324_v34  ;;  %v2193_v34 = vpack.c.bf16 %v2185_v41, %v2184_v43  ;;  %v2187_v47 = vld [vmem:[#allocation2 + $0x43] sm:$0xff] }
 0x185   : > { %3095 = vmatprep.mubr.msk.bf16.mxu0 %vm3358_vm0, %v3712_v59  ;;  %3149 = vmatprep.subr.bf16.mxu0 %v3712_v59 }
 0x186   : > { %3131 = vmatprep.mubr.msk.bf16.mxu1 %vm3358_vm0, %v3712_v59  ;;  %3184 = vmatpush3.bf16.msra.mxu1 %v3326_v38  ;;  %v2186_v38 = vld [vmem:[#allocation2 + $0x3b] sm:$0xff] }
 0x187   : > { %3185 = vmatprep.subr.bf16.mxu1 %v3712_v59 }
 0x188   : > { %3150 = vmatpush3.bf16.msra.mxu0 %v3325_v49  ;;  %v2194_v49 = vpack.c.bf16 %v2187_v47, %v2186_v38 }
 0x189   : > { %3151 = vmatprep.subr.bf16.mxu0 %v3712_v59 }
 0x18a   : > { %3186 = vmatpush3.bf16.msra.mxu1 %v3328_v58  ;;  %v2188_v58 = vld [vmem:[#allocation2 + $0x4b] sm:$0xff] }
 0x18b   : > { %3096 = vmatmul.mubr.bf16.gmra.mrb[76].mxu0 %v1541_v32  ;;  %3187 = vmatprep.subr.bf16.mxu1 %v3712_v59  ;;  %v3331_v32 = vld [vmem:[%s4151_s4 + $0x1a0] sm:$0xff]   ;;  %v2195_v57 = vpack.c.bf16 %v2189_v51, %v2188_v58 }
 0x18c   : > { %3132 = vmatmul.mubr.bf16.gmra.mrb[92].mxu1 %v1704_v52  ;;  %3152 = vmatpush3.bf16.msra.mxu0 %v3327_v7  ;;  %v2190_v7 = vld [vmem:[#allocation2 + $0x5b] sm:$0xff]  ;;  %v2191_v52 = vld [vmem:[#allocation2 + $0x63] sm:$0xff] }
 0x18d   : > { %3099 = vmatprep.mubr.msk.bf16.mxu0 %vm3358_vm0, %v3712_v59  ;;  %3153 = vmatprep.subr.bf16.mxu0 %v3712_v59 }
 0x18e   : > { %3135 = vmatprep.mubr.msk.bf16.mxu1 %vm3358_vm0, %v3712_v59  ;;  %3188 = vmatpush3.bf16.msra.mxu1 %v3330_v42  ;;  %v2196_v42 = vpack.c.bf16 %v2191_v52, %v2190_v7 }
 0x18f   : > { %3189 = vmatprep.subr.bf16.mxu1 %v3712_v59 }
 0x190   : > { %3154 = vmatpush3.bf16.msra.mxu0 %v3329_v53 }
 0x191   : > { %3155 = vmatprep.subr.bf16.mxu0 %v3712_v59 }
 0x192   : > { %3190 = vmatpush3.bf16.msra.mxu1 %v3332_v54 }
 0x193   : > { %3100 = vmatmul.mubr.bf16.gmra.mrb[80].mxu0 %v1542_v39  ;;  %3191 = vmatprep.subr.bf16.mxu1 %v3712_v59  ;;  %v3336_v39 = vld [vmem:[%s4151_s4 + $0x1b0] sm:$0xff]  }
 0x194   : > { %3136 = vmatmul.mubr.bf16.gmra.mrb[96].mxu1 %v1705_v55  ;;  %3156 = vmatpush3.bf16.msra.mxu0 %v3331_v32 }
 0x195   : > { %3103 = vmatprep.mubr.msk.bf16.mxu0 %vm3358_vm0, %v3712_v59  ;;  %3139 = vmatprep.mubr.msk.bf16.mxu1 %vm3358_vm0, %v3712_v59 }
 0x196   : > { %3157 = vmatprep.subr.bf16.mxu0 %v3712_v59  ;;  %3192 = vmatpush3.bf16.msra.mxu1 %v3334_v31 }
 0x197   : > { %3193 = vmatprep.subr.bf16.mxu1 %v3712_v59 }
 0x198   : > { %3158 = vmatpush3.bf16.msra.mxu0 %v3333_v56 }
 0x199   : > { %3159 = vmatprep.subr.bf16.mxu0 %v3712_v59 }
 0x19a   : > { %3194 = vmatpush3.bf16.msra.mxu1 %v3335_v48 }
 0x19b   : > { %3104 = vmatmul.mubr.bf16.gmra.mrb[84].mxu0 %v1543_v25  ;;  %3195 = vmatprep.subr.bf16.mxu1 %v3712_v59  ;;  %v1707_v25 = vpack.c.bf16 %v3985_v0, %v1701_v2 }
 0x19c   : > { %3140 = vmatmul.mubr.bf16.gmra.mrb[100].mxu1 %v1706_v60  ;;  %3160 = vmatpush3.bf16.msra.mxu0 %v3336_v39 }
 0x19d   : > { %3107 = vmatprep.mubr.msk.bf16.mxu0 %vm3358_vm0, %v3712_v59  ;;  %3143 = vmatprep.mubr.msk.bf16.mxu1 %vm3358_vm0, %v3712_v59 }
 0x19e   : > { %3161 = vmatprep.subr.bf16.mxu0 %v3712_v59  ;;  %3196 = vmatpush3.bf16.msra.mxu1 %v3337_v61 }
 0x19f   : > { %3197 = vmatprep.subr.bf16.mxu1 %v3712_v59 }
 0x1a0   : > { %3162 = vmatpush3.bf16.msra.mxu0 %v3338_v62 }
 0x1a1   : > { %3219 = vmatprep.subr.bf16.mxu0 %v3712_v59 }
 0x1a2   : > { %3198 = vmatpush3.bf16.msra.mxu1 %v3339_v6 }
 0x1a3   : > { %3108 = vmatmul.mubr.bf16.gmra.mrb[88].mxu0 %v1544_v44  ;;  %v2021_v44 = vld [vmem:[#allocation2 + $0x2a] sm:$0xff] }
 0x1a4   : > { %3144 = vmatmul.mubr.bf16.gmra.mrb[104].mxu1 %v1707_v25  ;;  %3163 = vmatprep.mubr.msk.bf16.mxu0 %vm3358_vm0, %v3712_v59  ;;  %v2030_v11 = vpack.c.bf16 %v2022_v40, %v2021_v44 }
 0x1a5   : > { %3199 = vmatprep.mubr.msk.bf16.mxu1 %vm3358_vm0, %v3712_v59 }
 0x1ab   : > { %3164 = vmatmul.mubr.bf16.vlgmr.msra.gmra.mrb[92].mxu0 %v1866_v5 }
 0x1ac   : > { %3200 = vmatmul.mubr.bf16.vlgmr.msra.gmra.mrb[108].mxu1 %v2029_v8  ;;  %3220 = vmatpush3.bf16.msra.mxu0 %v3340_v4 }
 0x1ad   : > { %3167 = vmatprep.mubr.msk.bf16.mxu0 %vm3358_vm0, %v3712_v59  ;;  %3221 = vmatprep.subr.bf16.mxu0 %v3712_v59 }
 0x1ae   : > { %3203 = vmatprep.mubr.msk.bf16.mxu1 %vm3358_vm0, %v3712_v59 }
 0x1b0   : > { %3222 = vmatpush3.bf16.msra.mxu0 %v3341_v28 }
 0x1b1   : > { %3223 = vmatprep.subr.bf16.mxu0 %v3712_v59 }
 0x1b3   : > { %3168 = vmatmul.mubr.bf16.gmra.mrb[96].mxu0 %v1867_v10 }
 0x1b4   : > { %3204 = vmatmul.mubr.bf16.gmra.mrb[112].mxu1 %v2030_v11  ;;  %3224 = vmatpush3.bf16.msra.mxu0 %v3342_v9 }
 0x1b5   : > { %3171 = vmatprep.mubr.msk.bf16.mxu0 %vm3358_vm0, %v3712_v59  ;;  %3225 = vmatprep.subr.bf16.mxu0 %v3712_v59 }
 0x1b6   : > { %3207 = vmatprep.mubr.msk.bf16.mxu1 %vm3358_vm0, %v3712_v59 }
 0x1b8   : > { %3226 = vmatpush3.bf16.msra.mxu0 %v3343_v14 }
 0x1b9   : > { %3227 = vmatprep.subr.bf16.mxu0 %v3712_v59 }
 0x1bb   : > { %3172 = vmatmul.mubr.bf16.gmra.mrb[100].mxu0 %v1868_v12 }
 0x1bc   : > { %3208 = vmatmul.mubr.bf16.gmra.mrb[116].mxu1 %v2031_v20  ;;  %3228 = vmatpush3.bf16.msra.mxu0 %v3344_v17 }
 0x1bd   : > { %3175 = vmatprep.mubr.msk.bf16.mxu0 %vm3358_vm0, %v3712_v59  ;;  %3211 = vmatprep.mubr.msk.bf16.mxu1 %vm3358_vm0, %v3712_v59 }
 0x1be   : > { %3229 = vmatprep.subr.bf16.mxu0 %v3712_v59 }
 0x1c0   : > { %3230 = vmatpush3.bf16.msra.mxu0 %v3345_v21 }
 0x1c1   : > { %3231 = vmatprep.subr.bf16.mxu0 %v3712_v59 }
 0x1c3   : > { %3176 = vmatmul.mubr.bf16.gmra.mrb[104].mxu0 %v1869_v26 }
 0x1c4   : > { %3212 = vmatmul.mubr.bf16.gmra.mrb[120].mxu1 %v2032_v27  ;;  %3232 = vmatpush3.bf16.msra.mxu0 %v3346_v23 }
 0x1c5   : > { %3179 = vmatprep.mubr.msk.bf16.mxu0 %vm3358_vm0, %v3712_v59  ;;  %3215 = vmatprep.mubr.msk.bf16.mxu1 %vm3358_vm0, %v3712_v59 }
 0x1c6   : > { %3233 = vmatprep.subr.bf16.mxu0 %v3712_v59 }
 0x1c8   : > { %3234 = vmatpush3.bf16.msra.mxu0 %v3347_v50 }
 0x1cb   : > { %3180 = vmatmul.mubr.bf16.gmra.mrb[108].mxu0 %v1870_v46 }
 0x1cc   : > { %3216 = vmatmul.mubr.bf16.gmra.mrb[124].mxu1 %v2033_v35  ;;  %3235 = vmatprep.mubr.msk.bf16.mxu0 %vm3358_vm0, %v3712_v59 }
 0x1d3   : > { %3236 = vmatmul.mubr.bf16.vlgmr.msra.gmra.mrb[112].mxu0 %v2192_v30 }
 0x1d4   : > { %3239 = vmatprep.mubr.msk.bf16.mxu0 %vm3358_vm0, %v3712_v59 }
 0x1db   : > { %3240 = vmatmul.mubr.bf16.gmra.mrb[116].mxu0 %v2193_v34 }
 0x1dc   : > { %3243 = vmatprep.mubr.msk.bf16.mxu0 %vm3358_vm0, %v3712_v59 }
 0x1e3   : > { %3244 = vmatmul.mubr.bf16.gmra.mrb[120].mxu0 %v2194_v49 }
 0x1e4   : > { %3247 = vmatprep.mubr.msk.bf16.mxu0 %vm3358_vm0, %v3712_v59 }
 0x1eb   : > { %3248 = vmatmul.mubr.bf16.gmra.mrb[124].mxu0 %v2195_v57 }
 0x1ec   : > { %3251 = vmatprep.mubr.msk.bf16.mxu0 %vm3358_vm0, %v3712_v59 }
 0x1f3   : > { %3252 = vmatmul.mubr.bf16.gmra.mrb[128].mxu0 %v2196_v42 }
 0x206   : > { %v1044_v53 = vpop.f32.mrb[32].mxu0 }
 0x207   : > { %v1165_v13 = vpop.f32.mrb[48].mxu1  ;;  %v2949_v32 = vpop.f32.mrb[33].mxu0 }
 0x208   : > { %v1166_v19 = vadd.f32 %v1165_v13, %v1044_v53  ;;  %v2985_v54 = vpop.f32.mrb[49].mxu1  ;;  %v1047_v55 = vpop.f32.mrb[34].mxu0 }
 0x209   : > { %v1168_v56 = vpop.f32.mrb[50].mxu1  ;;  %v2950_v1 = vpop.f32.mrb[35].mxu0 }
 0x20a   : > { %v1169_v31 = vadd.f32 %v1168_v56, %v1047_v55  ;;  %v2986_v37 = vpop.f32.mrb[51].mxu1 }
 0x20e   : > { %v1052_v48 = vpop.f32.mrb[36].mxu0 }
 0x20f   : > { %v1173_v39 = vpop.f32.mrb[52].mxu1  ;;  %v2953_v61 = vpop.f32.mrb[37].mxu0 }
 0x210   : > { %v1174_v60 = vadd.f32 %v1173_v39, %v1052_v48  ;;  %v2989_v62 = vpop.f32.mrb[53].mxu1  ;;  %v1055_v59 = vpop.f32.mrb[38].mxu0 }
 0x211   : > { %v1176_v2 = vpop.f32.mrb[54].mxu1  ;;  %v2954_v6 = vpop.f32.mrb[39].mxu0 }
 0x212   : > { %v1177_v0 = vadd.f32 %v1176_v2, %v1055_v59  ;;  %v2990_v25 = vpop.f32.mrb[55].mxu1 }
 0x216   : > { %v1060_v3 = vpop.f32.mrb[40].mxu0 }
 0x217   : > { %v1181_v63 = vpop.f32.mrb[56].mxu1  ;;  %v2957_v5 = vpop.f32.mrb[41].mxu0 }
 0x218   : > { %v1182_v4 = vadd.f32 %v1181_v63, %v1060_v3  ;;  %v2993_v8 = vpop.f32.mrb[57].mxu1  ;;  %v1063_v28 = vpop.f32.mrb[42].mxu0 }
 0x219   : > { %v1184_v40 = vpop.f32.mrb[58].mxu1  ;;  %v2958_v9 = vpop.f32.mrb[43].mxu0 }
 0x21a   : > { %v1185_v44 = vadd.f32 %v1184_v40, %v1063_v28  ;;  %v2994_v10 = vpop.f32.mrb[59].mxu1 }
 0x21e   : > { %v1068_v11 = vpop.f32.mrb[44].mxu0 }
 0x21f   : > { %v1189_v14 = vpop.f32.mrb[60].mxu1  ;;  %v2961_v16 = vpop.f32.mrb[45].mxu0 }
 0x220   : > { %v1190_v15 = vadd.f32 %v1189_v14, %v1068_v11  ;;  %v2997_v17 = vpop.f32.mrb[61].mxu1  ;;  %v1071_v12 = vpop.f32.mrb[46].mxu0 }
 0x221   : > { %v1192_v20 = vpop.f32.mrb[62].mxu1  ;;  %v2962_v22 = vpop.f32.mrb[47].mxu0 }
 0x222   : > { %v1193_v21 = vadd.f32 %v1192_v20, %v1071_v12  ;;  %v2998_v45 = vpop.f32.mrb[63].mxu1 }
 0x226   : > { %v1076_v23 = vpop.f32.mrb[48].mxu0 }
 0x227   : > { %v1197_v26 = vpop.f32.mrb[64].mxu1  ;;  %v2965_v50 = vpop.f32.mrb[49].mxu0 }
 0x228   : > { %v1198_v27 = vadd.f32 %v1197_v26, %v1076_v23  ;;  %v3001_v29 = vpop.f32.mrb[65].mxu1  ;;  %v1079_v18 = vpop.f32.mrb[50].mxu0 }
 0x229   : > { %v1200_v33 = vpop.f32.mrb[66].mxu1  ;;  %v2966_v35 = vpop.f32.mrb[51].mxu0 }
 0x22a   : > { %v1201_v46 = vadd.f32 %v1200_v33, %v1079_v18  ;;  %v3002_v24 = vpop.f32.mrb[67].mxu1 }
 0x22e   : > { %v1318_v36 = vpop.f32.mrb[52].mxu0 }
 0x22f   : > { %v1481_v30 = vpop.f32.mrb[68].mxu1  ;;  %v1357_v41 = vadd.f32 %v1318_v36, %v1166_v19  ;;  %v3021_v43 = vpop.f32.mrb[53].mxu0 }
 0x230   : > { %v3057_v34 = vpop.f32.mrb[69].mxu1  ;;  %v1321_v47 = vpop.f32.mrb[54].mxu0 }
 0x231   : > { %v1484_v38 = vpop.f32.mrb[70].mxu1  ;;  %v1520_v49 = vadd.f32 %v1481_v30, %v1357_v41  ;;  %v1358_v51 = vadd.f32 %v1321_v47, %v1169_v31  ;;  %v3022_v58 = vpop.f32.mrb[55].mxu0 }
 0x232   : > { %v3058_v57 = vpop.f32.mrb[71].mxu1 }
 0x233   : > { %v1521_v7 = vadd.f32 %v1484_v38, %v1358_v51 }
 0x236   : > { %v1326_v52 = vpop.f32.mrb[56].mxu0 }
 0x237   : > { %v1489_v42 = vpop.f32.mrb[72].mxu1  ;;  %v1359_v53 = vadd.f32 %v1326_v52, %v1174_v60  ;;  %v3025_v13 = vpop.f32.mrb[57].mxu0 }
 0x238   : > { %v3061_v32 = vpop.f32.mrb[73].mxu1  ;;  %v1329_v54 = vpop.f32.mrb[58].mxu0 }
 0x239   : > { %v1492_v55 = vpop.f32.mrb[74].mxu1  ;;  %v1522_v56 = vadd.f32 %v1489_v42, %v1359_v53  ;;  %v1360_v1 = vadd.f32 %v1329_v54, %v1177_v0  ;;  %v3026_v37 = vpop.f32.mrb[59].mxu0 }
 0x23a   : > { %v3062_v19 = vpop.f32.mrb[75].mxu1 }
 0x23b   : > { %v1523_v48 = vadd.f32 %v1492_v55, %v1360_v1 }
 0x23e   : > { %v1334_v39 = vpop.f32.mrb[60].mxu0 }
 0x23f   : > { %v1497_v61 = vpop.f32.mrb[76].mxu1  ;;  %v1361_v62 = vadd.f32 %v1334_v39, %v1182_v4  ;;  %v3029_v59 = vpop.f32.mrb[61].mxu0 }
 0x240   : > { %v3065_v31 = vpop.f32.mrb[77].mxu1  ;;  %v1337_v2 = vpop.f32.mrb[62].mxu0 }
 0x241   : > { %v1500_v6 = vpop.f32.mrb[78].mxu1  ;;  %v1524_v25 = vadd.f32 %v1497_v61, %v1361_v62  ;;  %v1362_v3 = vadd.f32 %v1337_v2, %v1185_v44  ;;  %v3030_v63 = vpop.f32.mrb[63].mxu0 }
 0x242   : > { %v3066_v60 = vpop.f32.mrb[79].mxu1 }
 0x243   : > { %v1525_v5 = vadd.f32 %v1500_v6, %v1362_v3 }
 0x246   : > { %v1342_v8 = vpop.f32.mrb[64].mxu0 }
 0x247   : > { %v1505_v28 = vpop.f32.mrb[80].mxu1  ;;  %v1363_v40 = vadd.f32 %v1342_v8, %v1190_v15  ;;  %v3033_v9 = vpop.f32.mrb[65].mxu0 }
 0x248   : > { %v3069_v0 = vpop.f32.mrb[81].mxu1  ;;  %v1345_v10 = vpop.f32.mrb[66].mxu0 }
 0x249   : > { %v1508_v11 = vpop.f32.mrb[82].mxu1  ;;  %v1526_v14 = vadd.f32 %v1505_v28, %v1363_v40  ;;  %v1364_v16 = vadd.f32 %v1345_v10, %v1193_v21  ;;  %v3034_v17 = vpop.f32.mrb[67].mxu0 }
 0x24a   : > { %v3070_v4 = vpop.f32.mrb[83].mxu1 }
 0x24b   : > { %v1527_v12 = vadd.f32 %v1508_v11, %v1364_v16 }
 0x24e   : > { %v1350_v20 = vpop.f32.mrb[68].mxu0 }
 0x24f   : > { %v1513_v22 = vpop.f32.mrb[84].mxu1  ;;  %v1365_v45 = vadd.f32 %v1350_v20, %v1198_v27  ;;  %v3037_v23 = vpop.f32.mrb[69].mxu0 }
 0x250   : > { %v3073_v44 = vpop.f32.mrb[85].mxu1  ;;  %v1353_v26 = vpop.f32.mrb[70].mxu0 }
 0x251   : > { %v1516_v50 = vpop.f32.mrb[86].mxu1  ;;  %v1528_v29 = vadd.f32 %v1513_v22, %v1365_v45  ;;  %v1366_v18 = vadd.f32 %v1353_v26, %v1201_v46  ;;  %v3038_v33 = vpop.f32.mrb[71].mxu0 }
 0x252   : > { %v3074_v15 = vpop.f32.mrb[87].mxu1 }
 0x253   : > { %v1529_v35 = vadd.f32 %v1516_v50, %v1366_v18 }
 0x256   : > { %v1644_v24 = vpop.f32.mrb[72].mxu0 }
 0x257   : > { %v1807_v36 = vpop.f32.mrb[88].mxu1  ;;  %v1683_v30 = vadd.f32 %v1644_v24, %v1520_v49  ;;  %v3093_v41 = vpop.f32.mrb[73].mxu0 }
 0x258   : > { %v3129_v21 = vpop.f32.mrb[89].mxu1  ;;  %v1647_v43 = vpop.f32.mrb[74].mxu0 }
 0x259   : > { %v1810_v34 = vpop.f32.mrb[90].mxu1  ;;  %v1846_v47 = vadd.f32 %v1807_v36, %v1683_v30  ;;  %v1684_v38 = vadd.f32 %v1647_v43, %v1521_v7  ;;  %v3094_v51 = vpop.f32.mrb[75].mxu0 }
 0x25a   : > { %v3130_v27 = vpop.f32.mrb[91].mxu1 }
 0x25b   : > { %v1847_v58 = vadd.f32 %v1810_v34, %v1684_v38 }
 0x25e   : > { %v1652_v57 = vpop.f32.mrb[76].mxu0 }
 0x25f   : > { %v1815_v52 = vpop.f32.mrb[92].mxu1  ;;  %v1685_v42 = vadd.f32 %v1652_v57, %v1522_v56  ;;  %v3097_v53 = vpop.f32.mrb[77].mxu0 }
 0x260   : > { %v3133_v46 = vpop.f32.mrb[93].mxu1  ;;  %v1655_v13 = vpop.f32.mrb[78].mxu0 }
 0x261   : > { %v1818_v32 = vpop.f32.mrb[94].mxu1  ;;  %v1848_v54 = vadd.f32 %v1815_v52, %v1685_v42  ;;  %v1686_v55 = vadd.f32 %v1655_v13, %v1523_v48  ;;  %v3098_v1 = vpop.f32.mrb[79].mxu0 }
 0x262   : > { %v3134_v49 = vpop.f32.mrb[95].mxu1 }
 0x263   : > { %v1849_v37 = vadd.f32 %v1818_v32, %v1686_v55 }
 0x266   : > { %v1660_v19 = vpop.f32.mrb[80].mxu0 }
 0x267   : > { %v1823_v39 = vpop.f32.mrb[96].mxu1  ;;  %v1687_v61 = vadd.f32 %v1660_v19, %v1524_v25  ;;  %v3101_v62 = vpop.f32.mrb[81].mxu0 }
 0x268   : > { %v3137_v7 = vpop.f32.mrb[97].mxu1  ;;  %v1663_v59 = vpop.f32.mrb[82].mxu0 }
 0x269   : > { %v1826_v31 = vpop.f32.mrb[98].mxu1  ;;  %v1850_v2 = vadd.f32 %v1823_v39, %v1687_v61  ;;  %v1688_v6 = vadd.f32 %v1663_v59, %v1525_v5  ;;  %v3102_v3 = vpop.f32.mrb[83].mxu0 }
 0x26a   : > { %v3138_v56 = vpop.f32.mrb[99].mxu1 }
 0x26b   : > { %v1851_v63 = vadd.f32 %v1826_v31, %v1688_v6 }
 0x26e   : > { %v1668_v60 = vpop.f32.mrb[84].mxu0 }
 0x26f   : > { %v1831_v8 = vpop.f32.mrb[100].mxu1  ;;  %v1689_v28 = vadd.f32 %v1668_v60, %v1526_v14  ;;  %v3105_v40 = vpop.f32.mrb[85].mxu0 }
 0x270   : > { %v3141_v48 = vpop.f32.mrb[101].mxu1  ;;  %v1671_v9 = vpop.f32.mrb[86].mxu0 }
 0x271   : > { %v1834_v0 = vpop.f32.mrb[102].mxu1  ;;  %v1852_v10 = vadd.f32 %v1831_v8, %v1689_v28  ;;  %v1690_v11 = vadd.f32 %v1671_v9, %v1527_v12  ;;  %v3106_v16 = vpop.f32.mrb[87].mxu0 }
 0x272   : > { %v3142_v25 = vpop.f32.mrb[103].mxu1 }
 0x273   : > { %v1853_v17 = vadd.f32 %v1834_v0, %v1690_v11 }
 0x276   : > { %v1676_v4 = vpop.f32.mrb[88].mxu0 }
 0x277   : > { %v1839_v20 = vpop.f32.mrb[104].mxu1  ;;  %v1691_v22 = vadd.f32 %v1676_v4, %v1528_v29  ;;  %v3109_v45 = vpop.f32.mrb[89].mxu0 }
 0x278   : > { %v3145_v5 = vpop.f32.mrb[105].mxu1  ;;  %v1679_v23 = vpop.f32.mrb[90].mxu0 }
 0x279   : > { %v1842_v44 = vpop.f32.mrb[106].mxu1  ;;  %v1854_v26 = vadd.f32 %v1839_v20, %v1691_v22  ;;  %v1692_v50 = vadd.f32 %v1679_v23, %v1529_v35  ;;  %v3110_v18 = vpop.f32.mrb[91].mxu0 }
 0x27a   : > { %v3146_v14 = vpop.f32.mrb[107].mxu1 }
 0x27b   : > { %v1855_v33 = vadd.f32 %v1842_v44, %v1692_v50 }
 0x27e   : > { %v1970_v15 = vpop.f32.mrb[92].mxu0 }
 0x27f   : > { %v2133_v24 = vpop.f32.mrb[108].mxu1  ;;  %v2009_v36 = vadd.f32 %v1970_v15, %v1846_v47  ;;  %v3165_v30 = vpop.f32.mrb[93].mxu0  ;;  %v300_v15 = vld [vmem:[%s4085_s17] sm:$0xff] }
 0x280   : > { %v3201_v12 = vpop.f32.mrb[109].mxu1  ;;  %v1973_v41 = vpop.f32.mrb[94].mxu0 }
 0x281   : > { %v2136_v21 = vpop.f32.mrb[110].mxu1  ;;  %v2172_v43 = vadd.f32 %v2133_v24, %v2009_v36  ;;  %v2010_v34 = vadd.f32 %v1973_v41, %v1847_v58  ;;  %v3166_v38 = vpop.f32.mrb[95].mxu0  ;;  %v301_v41 = vld [vmem:[%s4085_s17 + $0x8] sm:$0xff] }
 0x282   : > { %v3202_v29 = vpop.f32.mrb[111].mxu1 }
 0x283   : > { %v2173_v51 = vadd.f32 %v2136_v21, %v2010_v34 }
 0x286   : > { %v1978_v27 = vpop.f32.mrb[96].mxu0 }
 0x287   : > { %v2141_v57 = vpop.f32.mrb[112].mxu1  ;;  %v2011_v52 = vadd.f32 %v1978_v27, %v1848_v54  ;;  %v3169_v42 = vpop.f32.mrb[97].mxu0 }
 0x288   : > { %v3205_v35 = vpop.f32.mrb[113].mxu1  ;;  %v1981_v53 = vpop.f32.mrb[98].mxu0 }
 0x289   : > { %v2144_v46 = vpop.f32.mrb[114].mxu1  ;;  %v2174_v13 = vadd.f32 %v2141_v57, %v2011_v52  ;;  %v2012_v32 = vadd.f32 %v1981_v53, %v1849_v37  ;;  %v3170_v55 = vpop.f32.mrb[99].mxu0  ;;  %v302_v52 = vld [vmem:[%s4085_s17 + $0x10] sm:$0xff] }
 0x28a   : > { %v3206_v47 = vpop.f32.mrb[115].mxu1 }
 0x28b   : > { %v4067_v1 = vadd.f32 %v2144_v46, %v2012_v32  ;;  %v303_v32 = vld [vmem:[%s4085_s17 + $0x18] sm:$0xff] }
 0x28e   : > { %v1986_v49 = vpop.f32.mrb[100].mxu0 }
 0x28f   : > { %v2149_v19 = vpop.f32.mrb[116].mxu1  ;;  %v2013_v39 = vadd.f32 %v1986_v49, %v1850_v2  ;;  %v3173_v58 = vpop.f32.mrb[101].mxu0 }
 0x290   : > { %v3209_v61 = vpop.f32.mrb[117].mxu1  ;;  %v1989_v62 = vpop.f32.mrb[102].mxu0 }
 0x291   : > { %v2152_v7 = vpop.f32.mrb[118].mxu1  ;;  %v4069_v59 = vadd.f32 %v2149_v19, %v2013_v39  ;;  %v2014_v54 = vadd.f32 %v1989_v62, %v1851_v63  ;;  %v3174_v31 = vpop.f32.mrb[103].mxu0  ;;  %v304_v62 = vld [vmem:[%s4085_s17 + $0x20] sm:$0xff] }
 0x292   : > { %v3210_v6 = vpop.f32.mrb[119].mxu1 }
 0x293   : > { %v4071_v3 = vadd.f32 %v2152_v7, %v2014_v54  ;;  %v305_v6 = vld [vmem:[%s4085_s17 + $0x28] sm:$0xff] }
 0x296   : > { %v1994_v56 = vpop.f32.mrb[104].mxu0 }
 0x297   : > { %v2157_v37 = vpop.f32.mrb[120].mxu1  ;;  %v2015_v60 = vadd.f32 %v1994_v56, %v1852_v10  ;;  %v3177_v8 = vpop.f32.mrb[105].mxu0 }
 0x298   : > { %v3213_v28 = vpop.f32.mrb[121].mxu1  ;;  %v1997_v40 = vpop.f32.mrb[106].mxu0 }
 0x299   : > { %v2160_v48 = vpop.f32.mrb[122].mxu1  ;;  %v4073_v9 = vadd.f32 %v2157_v37, %v2015_v60  ;;  %v2016_v2 = vadd.f32 %v1997_v40, %v1853_v17  ;;  %v3178_v0 = vpop.f32.mrb[107].mxu0 }
 0x29a   : > { %v3214_v11 = vpop.f32.mrb[123].mxu1 }
 0x29b   : > { %v4075_v16 = vadd.f32 %v2160_v48, %v2016_v2  ;;  %v306_v2 = vld [vmem:[%s4085_s17 + $0x30] sm:$0xff] }
 0x29e   : > { %v2002_v63 = vpop.f32.mrb[108].mxu0 }
 0x29f   : > { %v2165_v25 = vpop.f32.mrb[124].mxu1  ;;  %v2017_v4 = vadd.f32 %v2002_v63, %v1854_v26  ;;  %v3181_v20 = vpop.f32.mrb[109].mxu0  ;;  %v4090_v26 = vld [vmem:[%s4152_s5] ss:$0 sm:$0xff] }
 0x2a0   : > { %v3217_v22 = vpop.f32.mrb[125].mxu1  ;;  %v2005_v45 = vpop.f32.mrb[110].mxu0 }
 0x2a1   : > { %v2168_v5 = vpop.f32.mrb[126].mxu1  ;;  %v4077_v10 = vadd.f32 %v2165_v25, %v2017_v4  ;;  %v2018_v23 = vadd.f32 %v2005_v45, %v1855_v33  ;;  %v3182_v44 = vpop.f32.mrb[111].mxu0  ;;  %v307_v25 = vld [vmem:[%s4085_s17 + $0x38] sm:$0xff] }
 0x2a2   : > { %v3218_v50 = vpop.f32.mrb[127].mxu1 }
 0x2a3   : > { %v4080_v18 = vadd.f32 %v2168_v5, %v2018_v23  ;;  %v308_v50 = vld [vmem:[%s4085_s17 + $0x40] sm:$0xff] }
 0x2a6   : > { %v2296_v17 = vpop.f32.mrb[112].mxu0 }
 0x2a7   : > { %v2335_v14 = vadd.f32 %v2296_v17, %v2172_v43  ;;  %v3237_v33 = vpop.f32.mrb[113].mxu0 }
 0x2a8   : > { %v2299_v24 = vpop.f32.mrb[114].mxu0 }
 0x2a9   : > { %v2352_v36 = vadd.f32 %v4090_v26, %v2335_v14  ;;  %v2336_v30 = vadd.f32 %v2299_v24, %v2173_v51  ;;  %v3238_v12 = vpop.f32.mrb[115].mxu0 }
 0x2ab   : > { %v2362_v21 = vadd.f32 %v2352_v36, %v300_v15  ;;  %v2353_v34 = vadd.f32 %v4090_v26, %v2336_v30  ;;  %v309_v15 = vld [vmem:[%s4085_s17 + $0x48] sm:$0xff] }
 0x2ad   : > { %v2372_v43 = vmax.f32 %v2362_v21, 0.0  ;;  %v2363_v38 = vadd.f32 %v2353_v34, %v301_v41 }
 0x2ae   : > { %v2304_v29 = vpop.f32.mrb[116].mxu0 }
 0x2af   : > { %2383 = vst.msk [vmem:[%s4099_s12] sm:$0xff] %vm2382_vm2, %v2372_v43  ;;  %v2373_v51 = vmax.f32 %v2363_v38, 0.0  ;;  %v2337_v27 = vadd.f32 %v2304_v29, %v2174_v13  ;;  %v3241_v57 = vpop.f32.mrb[117].mxu0 }
 0x2b0   : > { %v2307_v42 = vpop.f32.mrb[118].mxu0 }
 0x2b1   : > { %2384 = vst.msk [vmem:[%s4099_s12 + $0x8] sm:$0xff] %vm2382_vm2, %v2373_v51  ;;  %v2354_v35 = vadd.f32 %v4090_v26, %v2337_v27  ;;  %v2338_v53 = vadd.f32 %v2307_v42, %v4067_v1  ;;  %v3242_v46 = vpop.f32.mrb[119].mxu0 }
 0x2b3   : > { %v2364_v55 = vadd.f32 %v2354_v35, %v302_v52  ;;  %v2355_v47 = vadd.f32 %v4090_v26, %v2338_v53 }
 0x2b5   : > { %v2374_v49 = vmax.f32 %v2364_v55, 0.0  ;;  %v2365_v19 = vadd.f32 %v2355_v47, %v303_v32 }
 0x2b6   : > { %v2312_v13 = vpop.f32.mrb[120].mxu0 }
 0x2b7   : > { %2385 = vst.msk [vmem:[%s4099_s12 + $0x10] sm:$0xff] %vm2382_vm2, %v2374_v49  ;;  %v2375_v39 = vmax.f32 %v2365_v19, 0.0  ;;  %v2339_v58 = vadd.f32 %v2312_v13, %v4069_v59  ;;  %v3245_v61 = vpop.f32.mrb[121].mxu0 }
 0x2b8   : > { %v2315_v7 = vpop.f32.mrb[122].mxu0 }
 0x2b9   : > { %2386 = vst.msk [vmem:[%s4099_s12 + $0x18] sm:$0xff] %vm2382_vm2, %v2375_v39  ;;  %v2356_v1 = vadd.f32 %v4090_v26, %v2339_v58  ;;  %v2340_v54 = vadd.f32 %v2315_v7, %v4071_v3  ;;  %v3246_v31 = vpop.f32.mrb[123].mxu0 }
 0x2bb   : > { %v2366_v56 = vadd.f32 %v2356_v1, %v304_v62  ;;  %v2357_v37 = vadd.f32 %v4090_v26, %v2340_v54 }
 0x2bd   : > { %v2376_v60 = vmax.f32 %v2366_v56, 0.0  ;;  %v2367_v8 = vadd.f32 %v2357_v37, %v305_v6 }
 0x2be   : > { %v2320_v59 = vpop.f32.mrb[124].mxu0 }
 0x2bf   : > { %2387 = vst.msk [vmem:[%s4099_s12 + $0x20] sm:$0xff] %vm2382_vm2, %v2376_v60  ;;  %v2377_v28 = vmax.f32 %v2367_v8, 0.0  ;;  %v2341_v40 = vadd.f32 %v2320_v59, %v4073_v9  ;;  %v3249_v48 = vpop.f32.mrb[125].mxu0 }
 0x2c0   : > { %v2323_v0 = vpop.f32.mrb[126].mxu0 }
 0x2c1   : > { %2388 = vst.msk [vmem:[%s4099_s12 + $0x28] sm:$0xff] %vm2382_vm2, %v2377_v28  ;;  %v2358_v3 = vadd.f32 %v4090_v26, %v2341_v40  ;;  %v2342_v11 = vadd.f32 %v2323_v0, %v4075_v16  ;;  %v3250_v63 = vpop.f32.mrb[127].mxu0 }
 0x2c3   : > { %v2368_v4 = vadd.f32 %v2358_v3, %v306_v2  ;;  %v2359_v20 = vadd.f32 %v4090_v26, %v2342_v11 }
 0x2c5   : > { %v2378_v22 = vmax.f32 %v2368_v4, 0.0  ;;  %v2369_v45 = vadd.f32 %v2359_v20, %v307_v25 }
 0x2c6   : > { %v2328_v9 = vpop.f32.mrb[128].mxu0 }
 0x2c7   : > { %2389 = vst.msk [vmem:[%s4099_s12 + $0x30] sm:$0xff] %vm2382_vm2, %v2378_v22  ;;  %v2379_v5 = vmax.f32 %v2369_v45, 0.0  ;;  %v2343_v23 = vadd.f32 %v2328_v9, %v4077_v10  ;;  %v3253_v44 = vpop.f32.mrb[129].mxu0 }
 0x2c8   : > { %v2331_v17 = vpop.f32.mrb[130].mxu0 }
 0x2c9   : > { %2390 = vst.msk [vmem:[%s4099_s12 + $0x38] sm:$0xff] %vm2382_vm2, %v2379_v5  ;;  %v2360_v16 = vadd.f32 %v4090_v26, %v2343_v23  ;;  %v2344_v14 = vadd.f32 %v2331_v17, %v4080_v18  ;;  %v3254_v33 = vpop.f32.mrb[131].mxu0 }
 0x2cb   : > { %v2370_v24 = vadd.f32 %v2360_v16, %v308_v50  ;;  %v2361_v36 = vadd.f32 %v4090_v26, %v2344_v14 }
 0x2cd   : > { %v2380_v30 = vmax.f32 %v2370_v24, 0.0  ;;  %v2371_v12 = vadd.f32 %v2361_v36, %v309_v15 }
 0x2cf   : > { %2391 = vst.msk [vmem:[%s4099_s12 + $0x40] sm:$0xff] %vm2382_vm2, %v2380_v30  ;;  %v2381_v41 = vmax.f32 %v2371_v12, 0.0 }
 0x2d1   : > { %2392 = vst.msk [vmem:[%s4099_s12 + $0x48] sm:$0xff] %vm2382_vm2, %v2381_v41 }
 0x2d2 PF: > { %s17_s24 = sadd.s32 1, %s3355_s24  }
 0x2d3   : > { %p14_p4 = scmp.ge.s32.totalorder %s17_s24, 4  }
 0x2d5   :  { %16 = sbr.rel (!%p14_p4) target bundleno = 1 (0x1), region = 92 }

</bundles_post_ra>
